<compile_context>
chip_gen: v5e
topology: v5e:2x2
jax: 0.10.0
libtpu: 0.0.40
codegen_flags: <defaults>
</compile_context>

<pallas_src>
import jax
import jax.numpy as jnp
from jax.experimental import pallas as pl
from jax.experimental.pallas import tpu as pltpu  # noqa: F401  (TPU backend)

INPUT_DIM = 300
HIDDEN = 32
LAYERS = 2
OUTPUT_DIM = 1
SEQ_LEN = 8


def _lstm_kernel(x_ref, wih0_ref, wrec_ref, p_ref, out_ref):
    """2-layer LSTM recurrence + final Linear in one kernel invocation.

    Refs (all whole-array VMEM residents):
      x_ref:    (T, 300)   f32   time-major input (cast to bf16 in-kernel)
      wih0_ref: (300, 4H)  bf16  layer-0 W_ih^T, i/f/o columns pre-scaled by 0.5
      wrec_ref: (2H, 8H)   bf16  [[Whh0^T, Wih1^T],[0, Whh1^T]] fused recurrent weight
      p_ref:    (4, 4H)    f32   row0=b0, row1=b1, row2[:H]=fc weight, row3[0]=fc bias
      out_ref:  (T, 1)     f32
    """
    H = HIDDEN
    T = out_ref.shape[0]

    p = p_ref[...]
    b0 = p[0:1, :]                      # (1, 4H)  layer-0 bias (gate-prescaled)
    b1 = p[1:2, :]                      # (1, 4H)  layer-1 bias (gate-prescaled)
    wfc = p[2:3, 0:H]                   # (1, H)   fc weight row
    bfc = p[3:4, 0:1]                   # (1, 1)   fc bias

    # Batched layer-0 input projection: one MXU matmul, bf16 operands, f32 accumulation.
    g0_all = jnp.dot(x_ref[...].astype(jnp.bfloat16), wih0_ref[...],
                     preferred_element_type=jnp.float32) + b0          # (T, 4H)

    w_rec = wrec_ref[...]                                              # (2H, 8H) bf16

    def cell(z, c_prev):
        # z: (1, 4H) pre-activations; i/f/o columns were pre-scaled by 0.5 in init_params,
        # so sigmoid(raw) == 0.5*(1 + tanh(z)).  The g column is unscaled (plain tanh).
        th = jnp.tanh(z)                # single full-width EUP push for all four gates
        i = 0.5 * (th[:, 0:H] + 1.0)
        f = 0.5 * (th[:, H:2 * H] + 1.0)
        g = th[:, 2 * H:3 * H]
        o = 0.5 * (th[:, 3 * H:4 * H] + 1.0)
        c = f * c_prev + i * g
        h = o * jnp.tanh(c)
        return h, c

    rec0 = jnp.zeros((1, 4 * H), jnp.float32)   # h1_{-1} @ Whh0^T == 0
    h2 = jnp.zeros((1, H), jnp.float32)
    c1 = jnp.zeros((1, H), jnp.float32)
    c2 = jnp.zeros((1, H), jnp.float32)

    # Static unroll: T is a compile-time constant, so every slice / store index is static
    # and the whole recurrence is one basic block for the scheduler.
    for t in range(T):
        # ---- layer 0, step t ----
        h1, c1 = cell(g0_all[t:t + 1, :] + rec0, c1)

        # ---- fused recurrent matmul: [h1_t | h2_{t-1}] @ [[Whh0, Wih1],[0, Whh1]] ----
        hc = jnp.concatenate([h1, h2], axis=1).astype(jnp.bfloat16)    # (1, 2H)
        rec = jnp.dot(hc, w_rec, preferred_element_type=jnp.float32)   # (1, 8H)
        rec0 = rec[:, 0:4 * H]          # layer-0 recurrent term for step t+1

        # ---- layer 1, step t ----
        h2, c2 = cell(rec[:, 4 * H:8 * H] + b1, c2)

        # ---- fc folded into the loop: VPU multiply + lane reduce, one-row store ----
        out_ref[t:t + 1, :] = jnp.sum(h2 * wfc, axis=-1, keepdims=True) + bfc


def movie_review_classification(x, params):
    """x: (T, INPUT_DIM) f32 -> (T, 1) f32."""
    T = x.shape[0]
    return pl.pallas_call(
        _lstm_kernel,
        out_shape=jax.ShapeDtypeStruct((T, OUTPUT_DIM), jnp.float32),
    )(x, params["wih0_t"], params["w_rec"], params["p_f32"])


def init_params(key):
    """Deterministic init mimicking PyTorch's U(-1/sqrt(H), 1/sqrt(H)), pre-laid-out for the kernel."""
    ks = jax.random.split(key, 10)
    bound = 1.0 / jnp.sqrt(jnp.float32(HIDDEN))

    def u(k, shape):
        return jax.random.uniform(k, shape, jnp.float32, -bound, bound)

    H = HIDDEN
    # layer 0 (input_size = INPUT_DIM)
    w_ih0 = u(ks[0], (4 * H, INPUT_DIM))
    w_hh0 = u(ks[1], (4 * H, H))
    b_ih0 = u(ks[2], (4 * H,))
    b_hh0 = u(ks[3], (4 * H,))
    # layer 1 (input_size = HIDDEN)
    w_ih1 = u(ks[4], (4 * H, H))
    w_hh1 = u(ks[5], (4 * H, H))
    b_ih1 = u(ks[6], (4 * H,))
    b_hh1 = u(ks[7], (4 * H,))
    # fc (in_features = HIDDEN -> same bound)
    w_fc = u(ks[8], (OUTPUT_DIM, H))
    b_fc = u(ks[9], (OUTPUT_DIM,))

    raw = {"w_ih0": w_ih0, "w_hh0": w_hh0, "b_ih0": b_ih0, "b_hh0": b_hh0,
           "w_ih1": w_ih1, "w_hh1": w_hh1, "b_ih1": b_ih1, "b_hh1": b_hh1,
           "w_fc": w_fc, "b_fc": b_fc}

    # Pre-scale i/f/o pre-activation columns by 0.5 so the kernel needs one tanh per cell:
    # sigmoid(z) == 0.5 * (1 + tanh(0.5 * z)).  PyTorch gate order is [i, f, g, o].
    gate_scale = jnp.concatenate([0.5 * jnp.ones(2 * H), jnp.ones(H), 0.5 * jnp.ones(H)])

    wih0_t = (w_ih0.T * gate_scale).astype(jnp.bfloat16)                # (300, 4H)
    whh0_t = w_hh0.T * gate_scale                                       # (H, 4H)
    wih1_t = w_ih1.T * gate_scale                                       # (H, 4H)
    whh1_t = w_hh1.T * gate_scale                                       # (H, 4H)

    # Fused recurrent weight: [h1_t | h2_{t-1}] @ [[Whh0^T, Wih1^T],[0, Whh1^T]] -> (2H, 8H)
    w_rec_top = jnp.concatenate([whh0_t, wih1_t], axis=1)               # (H, 8H)
    w_rec_bot = jnp.concatenate([jnp.zeros((H, 4 * H), jnp.float32), whh1_t], axis=1)
    w_rec = jnp.concatenate([w_rec_top, w_rec_bot], axis=0).astype(jnp.bfloat16)   # (2H, 8H)

    b0 = (b_ih0 + b_hh0) * gate_scale
    b1 = (b_ih1 + b_hh1) * gate_scale

    # Pack the small f32 params into one (4, 4H) slab to cut input-DMA count.
    p_f32 = jnp.zeros((4, 4 * H), jnp.float32)
    p_f32 = p_f32.at[0, :].set(b0)
    p_f32 = p_f32.at[1, :].set(b1)
    p_f32 = p_f32.at[2, :H].set(w_fc[0])
    p_f32 = p_f32.at[3, 0].set(b_fc[0])

    return {"wih0_t": wih0_t, "w_rec": w_rec, "p_f32": p_f32}, raw


def _reference(x, raw):
    """Pure-JAX f32 reference matching PyTorch's eval-mode LSTM + Linear."""
    H = HIDDEN

    def cell(z, c_prev):
        i = jax.nn.sigmoid(z[0:H])
        f = jax.nn.sigmoid(z[H:2 * H])
        g = jnp.tanh(z[2 * H:3 * H])
        o = jax.nn.sigmoid(z[3 * H:4 * H])
        c = f * c_prev + i * g
        return o * jnp.tanh(c), c

    h1 = c1 = h2 = c2 = jnp.zeros((H,), jnp.float32)
    outs = []
    for t in range(x.shape[0]):
        z0 = raw["w_ih0"] @ x[t] + raw["b_ih0"] + raw["w_hh0"] @ h1 + raw["b_hh0"]
        h1, c1 = cell(z0, c1)
        z1 = raw["w_ih1"] @ h1 + raw["b_ih1"] + raw["w_hh1"] @ h2 + raw["b_hh1"]
        h2, c2 = cell(z1, c2)
        outs.append(raw["w_fc"] @ h2 + raw["b_fc"])
    return jnp.stack(outs)


if __name__ == "__main__":
    key = jax.random.PRNGKey(0)
    k_param, k_x = jax.random.split(key)
    params, raw = init_params(k_param)
    x = jax.random.normal(k_x, (SEQ_LEN, INPUT_DIM), jnp.float32)

    out = movie_review_classification(x, params)
    jax.block_until_ready(out)
    assert out.shape == (SEQ_LEN, OUTPUT_DIM)
    assert bool(jnp.all(jnp.isfinite(out)))

    # Loose tolerance: bf16 MXU operands on the recurrent path give ~1e-2-level divergence.
    ref = _reference(x, raw)
    assert bool(jnp.allclose(out, ref, atol=5e-2)), (out, ref)

    print("KERNEL_OK")
</pallas_src>

<mosaic_0001>
module attributes {stable_mosaic.version = 11 : i64} {
  func.func @_lstm_kernel(%arg0: memref<8x300xf32, #tpu.memory_space<vmem>>, %arg1: memref<300x128xbf16, #tpu.memory_space<vmem>>, %arg2: memref<64x256xbf16, #tpu.memory_space<vmem>>, %arg3: memref<4x128xf32, #tpu.memory_space<vmem>>, %arg4: memref<8x1xf32, #tpu.memory_space<vmem>>) attributes {dimension_semantics = [], scalar_prefetch = 0 : i64, scratch_operands = 0 : i64, tpu.core_type = #tpu.core_type<tc>} {
    %c0 = arith.constant 0 : index
    %c0_0 = arith.constant 0 : index
    %0 = vector.load %arg3[%c0, %c0_0] : memref<4x128xf32, #tpu.memory_space<vmem>>, vector<4x128xf32>
    %1 = vector.extract_strided_slice %0 {offsets = [0, 0], sizes = [1, 128], strides = [1, 1]} : vector<4x128xf32> to vector<1x128xf32>
    %2 = vector.extract_strided_slice %0 {offsets = [1, 0], sizes = [1, 128], strides = [1, 1]} : vector<4x128xf32> to vector<1x128xf32>
    %3 = vector.extract_strided_slice %0 {offsets = [2, 0], sizes = [1, 32], strides = [1, 1]} : vector<4x128xf32> to vector<1x32xf32>
    %4 = vector.extract_strided_slice %0 {offsets = [3, 0], sizes = [1, 1], strides = [1, 1]} : vector<4x128xf32> to vector<1x1xf32>
    %c0_1 = arith.constant 0 : index
    %c0_2 = arith.constant 0 : index
    %5 = vector.load %arg0[%c0_1, %c0_2] : memref<8x300xf32, #tpu.memory_space<vmem>>, vector<8x300xf32>
    %6 = arith.truncf %5 : vector<8x300xf32> to vector<8x300xbf16>
    %c0_3 = arith.constant 0 : index
    %c0_4 = arith.constant 0 : index
    %7 = vector.load %arg1[%c0_3, %c0_4] : memref<300x128xbf16, #tpu.memory_space<vmem>>, vector<300x128xbf16>
    %cst = arith.constant dense<0.000000e+00> : vector<8x128xf32>
    %8 = tpu.matmul %6, %7, %cst {dimension_numbers = #tpu.dot_dimension_numbers<[1], [0], [0], [1], [0, 0, 1, 1], [], []>} : vector<8x300xbf16>, vector<300x128xbf16>, vector<8x128xf32> -> vector<8x128xf32>
    %9 = vector.broadcast %1 : vector<1x128xf32> to vector<8x128xf32>
    %10 = arith.addf %8, %9 : vector<8x128xf32>
    %c0_5 = arith.constant 0 : index
    %c0_6 = arith.constant 0 : index
    %11 = vector.load %arg2[%c0_5, %c0_6] : memref<64x256xbf16, #tpu.memory_space<vmem>>, vector<64x256xbf16>
    %cst_7 = arith.constant 0.000000e+00 : f32
    %12 = vector.broadcast %cst_7 : f32 to vector<1x128xf32>
    %cst_8 = arith.constant 0.000000e+00 : f32
    %13 = vector.broadcast %cst_8 : f32 to vector<1x32xf32>
    %cst_9 = arith.constant 0.000000e+00 : f32
    %14 = vector.broadcast %cst_9 : f32 to vector<1x32xf32>
    %cst_10 = arith.constant 0.000000e+00 : f32
    %15 = vector.broadcast %cst_10 : f32 to vector<1x32xf32>
    %16 = vector.extract_strided_slice %10 {offsets = [0, 0], sizes = [1, 128], strides = [1, 1]} : vector<8x128xf32> to vector<1x128xf32>
    %17 = arith.addf %16, %12 : vector<1x128xf32>
    %18 = math.tanh %17 : vector<1x128xf32>
    %19 = vector.extract_strided_slice %18 {offsets = [0, 0], sizes = [1, 32], strides = [1, 1]} : vector<1x128xf32> to vector<1x32xf32>
    %cst_11 = arith.constant 1.000000e+00 : f32
    %20 = vector.broadcast %cst_11 : f32 to vector<1x32xf32>
    %21 = arith.addf %19, %20 : vector<1x32xf32>
    %cst_12 = arith.constant 5.000000e-01 : f32
    %22 = vector.broadcast %cst_12 : f32 to vector<1x32xf32>
    %23 = arith.mulf %22, %21 : vector<1x32xf32>
    %24 = vector.extract_strided_slice %18 {offsets = [0, 32], sizes = [1, 32], strides = [1, 1]} : vector<1x128xf32> to vector<1x32xf32>
    %cst_13 = arith.constant 1.000000e+00 : f32
    %25 = vector.broadcast %cst_13 : f32 to vector<1x32xf32>
    %26 = arith.addf %24, %25 : vector<1x32xf32>
    %cst_14 = arith.constant 5.000000e-01 : f32
    %27 = vector.broadcast %cst_14 : f32 to vector<1x32xf32>
    %28 = arith.mulf %27, %26 : vector<1x32xf32>
    %29 = vector.extract_strided_slice %18 {offsets = [0, 64], sizes = [1, 32], strides = [1, 1]} : vector<1x128xf32> to vector<1x32xf32>
    %30 = vector.extract_strided_slice %18 {offsets = [0, 96], sizes = [1, 32], strides = [1, 1]} : vector<1x128xf32> to vector<1x32xf32>
    %cst_15 = arith.constant 1.000000e+00 : f32
    %31 = vector.broadcast %cst_15 : f32 to vector<1x32xf32>
    %32 = arith.addf %30, %31 : vector<1x32xf32>
    %cst_16 = arith.constant 5.000000e-01 : f32
    %33 = vector.broadcast %cst_16 : f32 to vector<1x32xf32>
    %34 = arith.mulf %33, %32 : vector<1x32xf32>
    %35 = arith.mulf %28, %14 : vector<1x32xf32>
    %36 = arith.mulf %23, %29 : vector<1x32xf32>
    %37 = arith.addf %35, %36 : vector<1x32xf32>
    %38 = math.tanh %37 : vector<1x32xf32>
    %39 = arith.mulf %34, %38 : vector<1x32xf32>
    %40 = tpu.concatenate %39, %13 in 1 : vector<1x32xf32>, vector<1x32xf32> -> vector<1x64xf32>
    %41 = arith.truncf %40 : vector<1x64xf32> to vector<1x64xbf16>
    %cst_17 = arith.constant dense<0.000000e+00> : vector<1x256xf32>
    %42 = tpu.matmul %41, %11, %cst_17 {dimension_numbers = #tpu.dot_dimension_numbers<[1], [0], [0], [1], [0, 0, 1, 1], [], []>} : vector<1x64xbf16>, vector<64x256xbf16>, vector<1x256xf32> -> vector<1x256xf32>
    %43 = vector.extract_strided_slice %42 {offsets = [0, 0], sizes = [1, 128], strides = [1, 1]} : vector<1x256xf32> to vector<1x128xf32>
    %44 = vector.extract_strided_slice %42 {offsets = [0, 128], sizes = [1, 128], strides = [1, 1]} : vector<1x256xf32> to vector<1x128xf32>
    %45 = arith.addf %44, %2 : vector<1x128xf32>
    %46 = math.tanh %45 : vector<1x128xf32>
    %47 = vector.extract_strided_slice %46 {offsets = [0, 0], sizes = [1, 32], strides = [1, 1]} : vector<1x128xf32> to vector<1x32xf32>
    %cst_18 = arith.constant 1.000000e+00 : f32
    %48 = vector.broadcast %cst_18 : f32 to vector<1x32xf32>
    %49 = arith.addf %47, %48 : vector<1x32xf32>
    %cst_19 = arith.constant 5.000000e-01 : f32
    %50 = vector.broadcast %cst_19 : f32 to vector<1x32xf32>
    %51 = arith.mulf %50, %49 : vector<1x32xf32>
    %52 = vector.extract_strided_slice %46 {offsets = [0, 32], sizes = [1, 32], strides = [1, 1]} : vector<1x128xf32> to vector<1x32xf32>
    %cst_20 = arith.constant 1.000000e+00 : f32
    %53 = vector.broadcast %cst_20 : f32 to vector<1x32xf32>
    %54 = arith.addf %52, %53 : vector<1x32xf32>
    %cst_21 = arith.constant 5.000000e-01 : f32
    %55 = vector.broadcast %cst_21 : f32 to vector<1x32xf32>
    %56 = arith.mulf %55, %54 : vector<1x32xf32>
    %57 = vector.extract_strided_slice %46 {offsets = [0, 64], sizes = [1, 32], strides = [1, 1]} : vector<1x128xf32> to vector<1x32xf32>
    %58 = vector.extract_strided_slice %46 {offsets = [0, 96], sizes = [1, 32], strides = [1, 1]} : vector<1x128xf32> to vector<1x32xf32>
    %cst_22 = arith.constant 1.000000e+00 : f32
    %59 = vector.broadcast %cst_22 : f32 to vector<1x32xf32>
    %60 = arith.addf %58, %59 : vector<1x32xf32>
    %cst_23 = arith.constant 5.000000e-01 : f32
    %61 = vector.broadcast %cst_23 : f32 to vector<1x32xf32>
    %62 = arith.mulf %61, %60 : vector<1x32xf32>
    %63 = arith.mulf %56, %15 : vector<1x32xf32>
    %64 = arith.mulf %51, %57 : vector<1x32xf32>
    %65 = arith.addf %63, %64 : vector<1x32xf32>
    %66 = math.tanh %65 : vector<1x32xf32>
    %67 = arith.mulf %62, %66 : vector<1x32xf32>
    %68 = arith.mulf %67, %3 : vector<1x32xf32>
    %cst_24 = arith.constant dense<0.000000e+00> : vector<1xf32>
    %69 = vector.multi_reduction <add>, %68, %cst_24 [1] : vector<1x32xf32> to vector<1xf32>
    %70 = vector.shape_cast %69 : vector<1xf32> to vector<1x1xf32>
    %71 = arith.addf %70, %4 : vector<1x1xf32>
    %c0_25 = arith.constant 0 : index
    %c0_26 = arith.constant 0 : index
    %72 = vector.load %arg4[%c0_25, %c0_26] : memref<8x1xf32, #tpu.memory_space<vmem>>, vector<1x1xf32>
    tpu.vector_store %arg4[%c0_25, %c0_26], %71 {strides = array<i32>} : memref<8x1xf32, #tpu.memory_space<vmem>>, vector<1x1xf32>,
    %73 = vector.extract_strided_slice %10 {offsets = [1, 0], sizes = [1, 128], strides = [1, 1]} : vector<8x128xf32> to vector<1x128xf32>
    %74 = arith.addf %73, %43 : vector<1x128xf32>
    %75 = math.tanh %74 : vector<1x128xf32>
    %76 = vector.extract_strided_slice %75 {offsets = [0, 0], sizes = [1, 32], strides = [1, 1]} : vector<1x128xf32> to vector<1x32xf32>
    %cst_27 = arith.constant 1.000000e+00 : f32
    %77 = vector.broadcast %cst_27 : f32 to vector<1x32xf32>
    %78 = arith.addf %76, %77 : vector<1x32xf32>
    %cst_28 = arith.constant 5.000000e-01 : f32
    %79 = vector.broadcast %cst_28 : f32 to vector<1x32xf32>
    %80 = arith.mulf %79, %78 : vector<1x32xf32>
    %81 = vector.extract_strided_slice %75 {offsets = [0, 32], sizes = [1, 32], strides = [1, 1]} : vector<1x128xf32> to vector<1x32xf32>
    %cst_29 = arith.constant 1.000000e+00 : f32
    %82 = vector.broadcast %cst_29 : f32 to vector<1x32xf32>
    %83 = arith.addf %81, %82 : vector<1x32xf32>
    %cst_30 = arith.constant 5.000000e-01 : f32
    %84 = vector.broadcast %cst_30 : f32 to vector<1x32xf32>
    %85 = arith.mulf %84, %83 : vector<1x32xf32>
    %86 = vector.extract_strided_slice %75 {offsets = [0, 64], sizes = [1, 32], strides = [1, 1]} : vector<1x128xf32> to vector<1x32xf32>
    %87 = vector.extract_strided_slice %75 {offsets = [0, 96], sizes = [1, 32], strides = [1, 1]} : vector<1x128xf32> to vector<1x32xf32>
    %cst_31 = arith.constant 1.000000e+00 : f32
    %88 = vector.broadcast %cst_31 : f32 to vector<1x32xf32>
    %89 = arith.addf %87, %88 : vector<1x32xf32>
    %cst_32 = arith.constant 5.000000e-01 : f32
    %90 = vector.broadcast %cst_32 : f32 to vector<1x32xf32>
    %91 = arith.mulf %90, %89 : vector<1x32xf32>
    %92 = arith.mulf %85, %37 : vector<1x32xf32>
    %93 = arith.mulf %80, %86 : vector<1x32xf32>
    %94 = arith.addf %92, %93 : vector<1x32xf32>
    %95 = math.tanh %94 : vector<1x32xf32>
    %96 = arith.mulf %91, %95 : vector<1x32xf32>
    %97 = tpu.concatenate %96, %67 in 1 : vector<1x32xf32>, vector<1x32xf32> -> vector<1x64xf32>
    %98 = arith.truncf %97 : vector<1x64xf32> to vector<1x64xbf16>
    %cst_33 = arith.constant dense<0.000000e+00> : vector<1x256xf32>
    %99 = tpu.matmul %98, %11, %cst_33 {dimension_numbers = #tpu.dot_dimension_numbers<[1], [0], [0], [1], [0, 0, 1, 1], [], []>} : vector<1x64xbf16>, vector<64x256xbf16>, vector<1x256xf32> -> vector<1x256xf32>
    %100 = vector.extract_strided_slice %99 {offsets = [0, 0], sizes = [1, 128], strides = [1, 1]} : vector<1x256xf32> to vector<1x128xf32>
    %101 = vector.extract_strided_slice %99 {offsets = [0, 128], sizes = [1, 128], strides = [1, 1]} : vector<1x256xf32> to vector<1x128xf32>
    %102 = arith.addf %101, %2 : vector<1x128xf32>
    %103 = math.tanh %102 : vector<1x128xf32>
    %104 = vector.extract_strided_slice %103 {offsets = [0, 0], sizes = [1, 32], strides = [1, 1]} : vector<1x128xf32> to vector<1x32xf32>
    %cst_34 = arith.constant 1.000000e+00 : f32
    %105 = vector.broadcast %cst_34 : f32 to vector<1x32xf32>
    %106 = arith.addf %104, %105 : vector<1x32xf32>
    %cst_35 = arith.constant 5.000000e-01 : f32
    %107 = vector.broadcast %cst_35 : f32 to vector<1x32xf32>
    %108 = arith.mulf %107, %106 : vector<1x32xf32>
    %109 = vector.extract_strided_slice %103 {offsets = [0, 32], sizes = [1, 32], strides = [1, 1]} : vector<1x128xf32> to vector<1x32xf32>
    %cst_36 = arith.constant 1.000000e+00 : f32
    %110 = vector.broadcast %cst_36 : f32 to vector<1x32xf32>
    %111 = arith.addf %109, %110 : vector<1x32xf32>
    %cst_37 = arith.constant 5.000000e-01 : f32
    %112 = vector.broadcast %cst_37 : f32 to vector<1x32xf32>
    %113 = arith.mulf %112, %111 : vector<1x32xf32>
    %114 = vector.extract_strided_slice %103 {offsets = [0, 64], sizes = [1, 32], strides = [1, 1]} : vector<1x128xf32> to vector<1x32xf32>
    %115 = vector.extract_strided_slice %103 {offsets = [0, 96], sizes = [1, 32], strides = [1, 1]} : vector<1x128xf32> to vector<1x32xf32>
    %cst_38 = arith.constant 1.000000e+00 : f32
    %116 = vector.broadcast %cst_38 : f32 to vector<1x32xf32>
    %117 = arith.addf %115, %116 : vector<1x32xf32>
    %cst_39 = arith.constant 5.000000e-01 : f32
    %118 = vector.broadcast %cst_39 : f32 to vector<1x32xf32>
    %119 = arith.mulf %118, %117 : vector<1x32xf32>
    %120 = arith.mulf %113, %65 : vector<1x32xf32>
    %121 = arith.mulf %108, %114 : vector<1x32xf32>
    %122 = arith.addf %120, %121 : vector<1x32xf32>
    %123 = math.tanh %122 : vector<1x32xf32>
    %124 = arith.mulf %119, %123 : vector<1x32xf32>
    %125 = arith.mulf %124, %3 : vector<1x32xf32>
    %cst_40 = arith.constant dense<0.000000e+00> : vector<1xf32>
    %126 = vector.multi_reduction <add>, %125, %cst_40 [1] : vector<1x32xf32> to vector<1xf32>
    %127 = vector.shape_cast %126 : vector<1xf32> to vector<1x1xf32>
    %128 = arith.addf %127, %4 : vector<1x1xf32>
    %c1 = arith.constant 1 : index
    %c0_41 = arith.constant 0 : index
    %129 = vector.load %arg4[%c1, %c0_41] : memref<8x1xf32, #tpu.memory_space<vmem>>, vector<1x1xf32>
    tpu.vector_store %arg4[%c1, %c0_41], %128 {strides = array<i32>} : memref<8x1xf32, #tpu.memory_space<vmem>>, vector<1x1xf32>,
    %130 = vector.extract_strided_slice %10 {offsets = [2, 0], sizes = [1, 128], strides = [1, 1]} : vector<8x128xf32> to vector<1x128xf32>
    %131 = arith.addf %130, %100 : vector<1x128xf32>
    %132 = math.tanh %131 : vector<1x128xf32>
    %133 = vector.extract_strided_slice %132 {offsets = [0, 0], sizes = [1, 32], strides = [1, 1]} : vector<1x128xf32> to vector<1x32xf32>
    %cst_42 = arith.constant 1.000000e+00 : f32
    %134 = vector.broadcast %cst_42 : f32 to vector<1x32xf32>
    %135 = arith.addf %133, %134 : vector<1x32xf32>
    %cst_43 = arith.constant 5.000000e-01 : f32
    %136 = vector.broadcast %cst_43 : f32 to vector<1x32xf32>
    %137 = arith.mulf %136, %135 : vector<1x32xf32>
    %138 = vector.extract_strided_slice %132 {offsets = [0, 32], sizes = [1, 32], strides = [1, 1]} : vector<1x128xf32> to vector<1x32xf32>
    %cst_44 = arith.constant 1.000000e+00 : f32
    %139 = vector.broadcast %cst_44 : f32 to vector<1x32xf32>
    %140 = arith.addf %138, %139 : vector<1x32xf32>
    %cst_45 = arith.constant 5.000000e-01 : f32
    %141 = vector.broadcast %cst_45 : f32 to vector<1x32xf32>
    %142 = arith.mulf %141, %140 : vector<1x32xf32>
    %143 = vector.extract_strided_slice %132 {offsets = [0, 64], sizes = [1, 32], strides = [1, 1]} : vector<1x128xf32> to vector<1x32xf32>
    %144 = vector.extract_strided_slice %132 {offsets = [0, 96], sizes = [1, 32], strides = [1, 1]} : vector<1x128xf32> to vector<1x32xf32>
    %cst_46 = arith.constant 1.000000e+00 : f32
    %145 = vector.broadcast %cst_46 : f32 to vector<1x32xf32>
    %146 = arith.addf %144, %145 : vector<1x32xf32>
    %cst_47 = arith.constant 5.000000e-01 : f32
    %147 = vector.broadcast %cst_47 : f32 to vector<1x32xf32>
    %148 = arith.mulf %147, %146 : vector<1x32xf32>
    %149 = arith.mulf %142, %94 : vector<1x32xf32>
    %150 = arith.mulf %137, %143 : vector<1x32xf32>
    %151 = arith.addf %149, %150 : vector<1x32xf32>
    %152 = math.tanh %151 : vector<1x32xf32>
    %153 = arith.mulf %148, %152 : vector<1x32xf32>
    %154 = tpu.concatenate %153, %124 in 1 : vector<1x32xf32>, vector<1x32xf32> -> vector<1x64xf32>
    %155 = arith.truncf %154 : vector<1x64xf32> to vector<1x64xbf16>
    %cst_48 = arith.constant dense<0.000000e+00> : vector<1x256xf32>
    %156 = tpu.matmul %155, %11, %cst_48 {dimension_numbers = #tpu.dot_dimension_numbers<[1], [0], [0], [1], [0, 0, 1, 1], [], []>} : vector<1x64xbf16>, vector<64x256xbf16>, vector<1x256xf32> -> vector<1x256xf32>
    %157 = vector.extract_strided_slice %156 {offsets = [0, 0], sizes = [1, 128], strides = [1, 1]} : vector<1x256xf32> to vector<1x128xf32>
    %158 = vector.extract_strided_slice %156 {offsets = [0, 128], sizes = [1, 128], strides = [1, 1]} : vector<1x256xf32> to vector<1x128xf32>
    %159 = arith.addf %158, %2 : vector<1x128xf32>
    %160 = math.tanh %159 : vector<1x128xf32>
    %161 = vector.extract_strided_slice %160 {offsets = [0, 0], sizes = [1, 32], strides = [1, 1]} : vector<1x128xf32> to vector<1x32xf32>
    %cst_49 = arith.constant 1.000000e+00 : f32
    %162 = vector.broadcast %cst_49 : f32 to vector<1x32xf32>
    %163 = arith.addf %161, %162 : vector<1x32xf32>
    %cst_50 = arith.constant 5.000000e-01 : f32
    %164 = vector.broadcast %cst_50 : f32 to vector<1x32xf32>
    %165 = arith.mulf %164, %163 : vector<1x32xf32>
    %166 = vector.extract_strided_slice %160 {offsets = [0, 32], sizes = [1, 32], strides = [1, 1]} : vector<1x128xf32> to vector<1x32xf32>
    %cst_51 = arith.constant 1.000000e+00 : f32
    %167 = vector.broadcast %cst_51 : f32 to vector<1x32xf32>
    %168 = arith.addf %166, %167 : vector<1x32xf32>
    %cst_52 = arith.constant 5.000000e-01 : f32
    %169 = vector.broadcast %cst_52 : f32 to vector<1x32xf32>
    %170 = arith.mulf %169, %168 : vector<1x32xf32>
    %171 = vector.extract_strided_slice %160 {offsets = [0, 64], sizes = [1, 32], strides = [1, 1]} : vector<1x128xf32> to vector<1x32xf32>
    %172 = vector.extract_strided_slice %160 {offsets = [0, 96], sizes = [1, 32], strides = [1, 1]} : vector<1x128xf32> to vector<1x32xf32>
    %cst_53 = arith.constant 1.000000e+00 : f32
    %173 = vector.broadcast %cst_53 : f32 to vector<1x32xf32>
    %174 = arith.addf %172, %173 : vector<1x32xf32>
    %cst_54 = arith.constant 5.000000e-01 : f32
    %175 = vector.broadcast %cst_54 : f32 to vector<1x32xf32>
    %176 = arith.mulf %175, %174 : vector<1x32xf32>
    %177 = arith.mulf %170, %122 : vector<1x32xf32>
    %178 = arith.mulf %165, %171 : vector<1x32xf32>
    %179 = arith.addf %177, %178 : vector<1x32xf32>
    %180 = math.tanh %179 : vector<1x32xf32>
    %181 = arith.mulf %176, %180 : vector<1x32xf32>
    %182 = arith.mulf %181, %3 : vector<1x32xf32>
    %cst_55 = arith.constant dense<0.000000e+00> : vector<1xf32>
    %183 = vector.multi_reduction <add>, %182, %cst_55 [1] : vector<1x32xf32> to vector<1xf32>
    %184 = vector.shape_cast %183 : vector<1xf32> to vector<1x1xf32>
    %185 = arith.addf %184, %4 : vector<1x1xf32>
    %c2 = arith.constant 2 : index
    %c0_56 = arith.constant 0 : index
    %186 = vector.load %arg4[%c2, %c0_56] : memref<8x1xf32, #tpu.memory_space<vmem>>, vector<1x1xf32>
    tpu.vector_store %arg4[%c2, %c0_56], %185 {strides = array<i32>} : memref<8x1xf32, #tpu.memory_space<vmem>>, vector<1x1xf32>,
    %187 = vector.extract_strided_slice %10 {offsets = [3, 0], sizes = [1, 128], strides = [1, 1]} : vector<8x128xf32> to vector<1x128xf32>
    %188 = arith.addf %187, %157 : vector<1x128xf32>
    %189 = math.tanh %188 : vector<1x128xf32>
    %190 = vector.extract_strided_slice %189 {offsets = [0, 0], sizes = [1, 32], strides = [1, 1]} : vector<1x128xf32> to vector<1x32xf32>
    %cst_57 = arith.constant 1.000000e+00 : f32
    %191 = vector.broadcast %cst_57 : f32 to vector<1x32xf32>
    %192 = arith.addf %190, %191 : vector<1x32xf32>
    %cst_58 = arith.constant 5.000000e-01 : f32
    %193 = vector.broadcast %cst_58 : f32 to vector<1x32xf32>
    %194 = arith.mulf %193, %192 : vector<1x32xf32>
    %195 = vector.extract_strided_slice %189 {offsets = [0, 32], sizes = [1, 32], strides = [1, 1]} : vector<1x128xf32> to vector<1x32xf32>
    %cst_59 = arith.constant 1.000000e+00 : f32
    %196 = vector.broadcast %cst_59 : f32 to vector<1x32xf32>
    %197 = arith.addf %195, %196 : vector<1x32xf32>
    %cst_60 = arith.constant 5.000000e-01 : f32
    %198 = vector.broadcast %cst_60 : f32 to vector<1x32xf32>
    %199 = arith.mulf %198, %197 : vector<1x32xf32>
    %200 = vector.extract_strided_slice %189 {offsets = [0, 64], sizes = [1, 32], strides = [1, 1]} : vector<1x128xf32> to vector<1x32xf32>
    %201 = vector.extract_strided_slice %189 {offsets = [0, 96], sizes = [1, 32], strides = [1, 1]} : vector<1x128xf32> to vector<1x32xf32>
    %cst_61 = arith.constant 1.000000e+00 : f32
    %202 = vector.broadcast %cst_61 : f32 to vector<1x32xf32>
    %203 = arith.addf %201, %202 : vector<1x32xf32>
    %cst_62 = arith.constant 5.000000e-01 : f32
    %204 = vector.broadcast %cst_62 : f32 to vector<1x32xf32>
    %205 = arith.mulf %204, %203 : vector<1x32xf32>
    %206 = arith.mulf %199, %151 : vector<1x32xf32>
    %207 = arith.mulf %194, %200 : vector<1x32xf32>
    %208 = arith.addf %206, %207 : vector<1x32xf32>
    %209 = math.tanh %208 : vector<1x32xf32>
    %210 = arith.mulf %205, %209 : vector<1x32xf32>
    %211 = tpu.concatenate %210, %181 in 1 : vector<1x32xf32>, vector<1x32xf32> -> vector<1x64xf32>
    %212 = arith.truncf %211 : vector<1x64xf32> to vector<1x64xbf16>
    %cst_63 = arith.constant dense<0.000000e+00> : vector<1x256xf32>
    %213 = tpu.matmul %212, %11, %cst_63 {dimension_numbers = #tpu.dot_dimension_numbers<[1], [0], [0], [1], [0, 0, 1, 1], [], []>} : vector<1x64xbf16>, vector<64x256xbf16>, vector<1x256xf32> -> vector<1x256xf32>
    %214 = vector.extract_strided_slice %213 {offsets = [0, 0], sizes = [1, 128], strides = [1, 1]} : vector<1x256xf32> to vector<1x128xf32>
    %215 = vector.extract_strided_slice %213 {offsets = [0, 128], sizes = [1, 128], strides = [1, 1]} : vector<1x256xf32> to vector<1x128xf32>
    %216 = arith.addf %215, %2 : vector<1x128xf32>
    %217 = math.tanh %216 : vector<1x128xf32>
    %218 = vector.extract_strided_slice %217 {offsets = [0, 0], sizes = [1, 32], strides = [1, 1]} : vector<1x128xf32> to vector<1x32xf32>
    %cst_64 = arith.constant 1.000000e+00 : f32
    %219 = vector.broadcast %cst_64 : f32 to vector<1x32xf32>
    %220 = arith.addf %218, %219 : vector<1x32xf32>
    %cst_65 = arith.constant 5.000000e-01 : f32
    %221 = vector.broadcast %cst_65 : f32 to vector<1x32xf32>
    %222 = arith.mulf %221, %220 : vector<1x32xf32>
    %223 = vector.extract_strided_slice %217 {offsets = [0, 32], sizes = [1, 32], strides = [1, 1]} : vector<1x128xf32> to vector<1x32xf32>
    %cst_66 = arith.constant 1.000000e+00 : f32
    %224 = vector.broadcast %cst_66 : f32 to vector<1x32xf32>
    %225 = arith.addf %223, %224 : vector<1x32xf32>
    %cst_67 = arith.constant 5.000000e-01 : f32
    %226 = vector.broadcast %cst_67 : f32 to vector<1x32xf32>
    %227 = arith.mulf %226, %225 : vector<1x32xf32>
    %228 = vector.extract_strided_slice %217 {offsets = [0, 64], sizes = [1, 32], strides = [1, 1]} : vector<1x128xf32> to vector<1x32xf32>
    %229 = vector.extract_strided_slice %217 {offsets = [0, 96], sizes = [1, 32], strides = [1, 1]} : vector<1x128xf32> to vector<1x32xf32>
    %cst_68 = arith.constant 1.000000e+00 : f32
    %230 = vector.broadcast %cst_68 : f32 to vector<1x32xf32>
    %231 = arith.addf %229, %230 : vector<1x32xf32>
    %cst_69 = arith.constant 5.000000e-01 : f32
    %232 = vector.broadcast %cst_69 : f32 to vector<1x32xf32>
    %233 = arith.mulf %232, %231 : vector<1x32xf32>
    %234 = arith.mulf %227, %179 : vector<1x32xf32>
    %235 = arith.mulf %222, %228 : vector<1x32xf32>
    %236 = arith.addf %234, %235 : vector<1x32xf32>
    %237 = math.tanh %236 : vector<1x32xf32>
    %238 = arith.mulf %233, %237 : vector<1x32xf32>
    %239 = arith.mulf %238, %3 : vector<1x32xf32>
    %cst_70 = arith.constant dense<0.000000e+00> : vector<1xf32>
    %240 = vector.multi_reduction <add>, %239, %cst_70 [1] : vector<1x32xf32> to vector<1xf32>
    %241 = vector.shape_cast %240 : vector<1xf32> to vector<1x1xf32>
    %242 = arith.addf %241, %4 : vector<1x1xf32>
    %c3 = arith.constant 3 : index
    %c0_71 = arith.constant 0 : index
    %243 = vector.load %arg4[%c3, %c0_71] : memref<8x1xf32, #tpu.memory_space<vmem>>, vector<1x1xf32>
    tpu.vector_store %arg4[%c3, %c0_71], %242 {strides = array<i32>} : memref<8x1xf32, #tpu.memory_space<vmem>>, vector<1x1xf32>,
    %244 = vector.extract_strided_slice %10 {offsets = [4, 0], sizes = [1, 128], strides = [1, 1]} : vector<8x128xf32> to vector<1x128xf32>
    %245 = arith.addf %244, %214 : vector<1x128xf32>
    %246 = math.tanh %245 : vector<1x128xf32>
    %247 = vector.extract_strided_slice %246 {offsets = [0, 0], sizes = [1, 32], strides = [1, 1]} : vector<1x128xf32> to vector<1x32xf32>
    %cst_72 = arith.constant 1.000000e+00 : f32
    %248 = vector.broadcast %cst_72 : f32 to vector<1x32xf32>
    %249 = arith.addf %247, %248 : vector<1x32xf32>
    %cst_73 = arith.constant 5.000000e-01 : f32
    %250 = vector.broadcast %cst_73 : f32 to vector<1x32xf32>
    %251 = arith.mulf %250, %249 : vector<1x32xf32>
    %252 = vector.extract_strided_slice %246 {offsets = [0, 32], sizes = [1, 32], strides = [1, 1]} : vector<1x128xf32> to vector<1x32xf32>
    %cst_74 = arith.constant 1.000000e+00 : f32
    %253 = vector.broadcast %cst_74 : f32 to vector<1x32xf32>
    %254 = arith.addf %252, %253 : vector<1x32xf32>
    %cst_75 = arith.constant 5.000000e-01 : f32
    %255 = vector.broadcast %cst_75 : f32 to vector<1x32xf32>
    %256 = arith.mulf %255, %254 : vector<1x32xf32>
    %257 = vector.extract_strided_slice %246 {offsets = [0, 64], sizes = [1, 32], strides = [1, 1]} : vector<1x128xf32> to vector<1x32xf32>
    %258 = vector.extract_strided_slice %246 {offsets = [0, 96], sizes = [1, 32], strides = [1, 1]} : vector<1x128xf32> to vector<1x32xf32>
    %cst_76 = arith.constant 1.000000e+00 : f32
    %259 = vector.broadcast %cst_76 : f32 to vector<1x32xf32>
    %260 = arith.addf %258, %259 : vector<1x32xf32>
    %cst_77 = arith.constant 5.000000e-01 : f32
    %261 = vector.broadcast %cst_77 : f32 to vector<1x32xf32>
    %262 = arith.mulf %261, %260 : vector<1x32xf32>
    %263 = arith.mulf %256, %208 : vector<1x32xf32>
    %264 = arith.mulf %251, %257 : vector<1x32xf32>
    %265 = arith.addf %263, %264 : vector<1x32xf32>
    %266 = math.tanh %265 : vector<1x32xf32>
    %267 = arith.mulf %262, %266 : vector<1x32xf32>
    %268 = tpu.concatenate %267, %238 in 1 : vector<1x32xf32>, vector<1x32xf32> -> vector<1x64xf32>
    %269 = arith.truncf %268 : vector<1x64xf32> to vector<1x64xbf16>
    %cst_78 = arith.constant dense<0.000000e+00> : vector<1x256xf32>
    %270 = tpu.matmul %269, %11, %cst_78 {dimension_numbers = #tpu.dot_dimension_numbers<[1], [0], [0], [1], [0, 0, 1, 1], [], []>} : vector<1x64xbf16>, vector<64x256xbf16>, vector<1x256xf32> -> vector<1x256xf32>
    %271 = vector.extract_strided_slice %270 {offsets = [0, 0], sizes = [1, 128], strides = [1, 1]} : vector<1x256xf32> to vector<1x128xf32>
    %272 = vector.extract_strided_slice %270 {offsets = [0, 128], sizes = [1, 128], strides = [1, 1]} : vector<1x256xf32> to vector<1x128xf32>
    %273 = arith.addf %272, %2 : vector<1x128xf32>
    %274 = math.tanh %273 : vector<1x128xf32>
    %275 = vector.extract_strided_slice %274 {offsets = [0, 0], sizes = [1, 32], strides = [1, 1]} : vector<1x128xf32> to vector<1x32xf32>
    %cst_79 = arith.constant 1.000000e+00 : f32
    %276 = vector.broadcast %cst_79 : f32 to vector<1x32xf32>
    %277 = arith.addf %275, %276 : vector<1x32xf32>
    %cst_80 = arith.constant 5.000000e-01 : f32
    %278 = vector.broadcast %cst_80 : f32 to vector<1x32xf32>
    %279 = arith.mulf %278, %277 : vector<1x32xf32>
    %280 = vector.extract_strided_slice %274 {offsets = [0, 32], sizes = [1, 32], strides = [1, 1]} : vector<1x128xf32> to vector<1x32xf32>
    %cst_81 = arith.constant 1.000000e+00 : f32
    %281 = vector.broadcast %cst_81 : f32 to vector<1x32xf32>
    %282 = arith.addf %280, %281 : vector<1x32xf32>
    %cst_82 = arith.constant 5.000000e-01 : f32
    %283 = vector.broadcast %cst_82 : f32 to vector<1x32xf32>
    %284 = arith.mulf %283, %282 : vector<1x32xf32>
    %285 = vector.extract_strided_slice %274 {offsets = [0, 64], sizes = [1, 32], strides = [1, 1]} : vector<1x128xf32> to vector<1x32xf32>
    %286 = vector.extract_strided_slice %274 {offsets = [0, 96], sizes = [1, 32], strides = [1, 1]} : vector<1x128xf32> to vector<1x32xf32>
    %cst_83 = arith.constant 1.000000e+00 : f32
    %287 = vector.broadcast %cst_83 : f32 to vector<1x32xf32>
    %288 = arith.addf %286, %287 : vector<1x32xf32>
    %cst_84 = arith.constant 5.000000e-01 : f32
    %289 = vector.broadcast %cst_84 : f32 to vector<1x32xf32>
    %290 = arith.mulf %289, %288 : vector<1x32xf32>
    %291 = arith.mulf %284, %236 : vector<1x32xf32>
    %292 = arith.mulf %279, %285 : vector<1x32xf32>
    %293 = arith.addf %291, %292 : vector<1x32xf32>
    %294 = math.tanh %293 : vector<1x32xf32>
    %295 = arith.mulf %290, %294 : vector<1x32xf32>
    %296 = arith.mulf %295, %3 : vector<1x32xf32>
    %cst_85 = arith.constant dense<0.000000e+00> : vector<1xf32>
    %297 = vector.multi_reduction <add>, %296, %cst_85 [1] : vector<1x32xf32> to vector<1xf32>
    %298 = vector.shape_cast %297 : vector<1xf32> to vector<1x1xf32>
    %299 = arith.addf %298, %4 : vector<1x1xf32>
    %c4 = arith.constant 4 : index
    %c0_86 = arith.constant 0 : index
    %300 = vector.load %arg4[%c4, %c0_86] : memref<8x1xf32, #tpu.memory_space<vmem>>, vector<1x1xf32>
    tpu.vector_store %arg4[%c4, %c0_86], %299 {strides = array<i32>} : memref<8x1xf32, #tpu.memory_space<vmem>>, vector<1x1xf32>,
    %301 = vector.extract_strided_slice %10 {offsets = [5, 0], sizes = [1, 128], strides = [1, 1]} : vector<8x128xf32> to vector<1x128xf32>
    %302 = arith.addf %301, %271 : vector<1x128xf32>
    %303 = math.tanh %302 : vector<1x128xf32>
    %304 = vector.extract_strided_slice %303 {offsets = [0, 0], sizes = [1, 32], strides = [1, 1]} : vector<1x128xf32> to vector<1x32xf32>
    %cst_87 = arith.constant 1.000000e+00 : f32
    %305 = vector.broadcast %cst_87 : f32 to vector<1x32xf32>
    %306 = arith.addf %304, %305 : vector<1x32xf32>
    %cst_88 = arith.constant 5.000000e-01 : f32
    %307 = vector.broadcast %cst_88 : f32 to vector<1x32xf32>
    %308 = arith.mulf %307, %306 : vector<1x32xf32>
    %309 = vector.extract_strided_slice %303 {offsets = [0, 32], sizes = [1, 32], strides = [1, 1]} : vector<1x128xf32> to vector<1x32xf32>
    %cst_89 = arith.constant 1.000000e+00 : f32
    %310 = vector.broadcast %cst_89 : f32 to vector<1x32xf32>
    %311 = arith.addf %309, %310 : vector<1x32xf32>
    %cst_90 = arith.constant 5.000000e-01 : f32
    %312 = vector.broadcast %cst_90 : f32 to vector<1x32xf32>
    %313 = arith.mulf %312, %311 : vector<1x32xf32>
    %314 = vector.extract_strided_slice %303 {offsets = [0, 64], sizes = [1, 32], strides = [1, 1]} : vector<1x128xf32> to vector<1x32xf32>
    %315 = vector.extract_strided_slice %303 {offsets = [0, 96], sizes = [1, 32], strides = [1, 1]} : vector<1x128xf32> to vector<1x32xf32>
    %cst_91 = arith.constant 1.000000e+00 : f32
    %316 = vector.broadcast %cst_91 : f32 to vector<1x32xf32>
    %317 = arith.addf %315, %316 : vector<1x32xf32>
    %cst_92 = arith.constant 5.000000e-01 : f32
    %318 = vector.broadcast %cst_92 : f32 to vector<1x32xf32>
    %319 = arith.mulf %318, %317 : vector<1x32xf32>
    %320 = arith.mulf %313, %265 : vector<1x32xf32>
    %321 = arith.mulf %308, %314 : vector<1x32xf32>
    %322 = arith.addf %320, %321 : vector<1x32xf32>
    %323 = math.tanh %322 : vector<1x32xf32>
    %324 = arith.mulf %319, %323 : vector<1x32xf32>
    %325 = tpu.concatenate %324, %295 in 1 : vector<1x32xf32>, vector<1x32xf32> -> vector<1x64xf32>
    %326 = arith.truncf %325 : vector<1x64xf32> to vector<1x64xbf16>
    %cst_93 = arith.constant dense<0.000000e+00> : vector<1x256xf32>
    %327 = tpu.matmul %326, %11, %cst_93 {dimension_numbers = #tpu.dot_dimension_numbers<[1], [0], [0], [1], [0, 0, 1, 1], [], []>} : vector<1x64xbf16>, vector<64x256xbf16>, vector<1x256xf32> -> vector<1x256xf32>
    %328 = vector.extract_strided_slice %327 {offsets = [0, 0], sizes = [1, 128], strides = [1, 1]} : vector<1x256xf32> to vector<1x128xf32>
    %329 = vector.extract_strided_slice %327 {offsets = [0, 128], sizes = [1, 128], strides = [1, 1]} : vector<1x256xf32> to vector<1x128xf32>
    %330 = arith.addf %329, %2 : vector<1x128xf32>
    %331 = math.tanh %330 : vector<1x128xf32>
    %332 = vector.extract_strided_slice %331 {offsets = [0, 0], sizes = [1, 32], strides = [1, 1]} : vector<1x128xf32> to vector<1x32xf32>
    %cst_94 = arith.constant 1.000000e+00 : f32
    %333 = vector.broadcast %cst_94 : f32 to vector<1x32xf32>
    %334 = arith.addf %332, %333 : vector<1x32xf32>
    %cst_95 = arith.constant 5.000000e-01 : f32
    %335 = vector.broadcast %cst_95 : f32 to vector<1x32xf32>
    %336 = arith.mulf %335, %334 : vector<1x32xf32>
    %337 = vector.extract_strided_slice %331 {offsets = [0, 32], sizes = [1, 32], strides = [1, 1]} : vector<1x128xf32> to vector<1x32xf32>
    %cst_96 = arith.constant 1.000000e+00 : f32
    %338 = vector.broadcast %cst_96 : f32 to vector<1x32xf32>
    %339 = arith.addf %337, %338 : vector<1x32xf32>
    %cst_97 = arith.constant 5.000000e-01 : f32
    %340 = vector.broadcast %cst_97 : f32 to vector<1x32xf32>
    %341 = arith.mulf %340, %339 : vector<1x32xf32>
    %342 = vector.extract_strided_slice %331 {offsets = [0, 64], sizes = [1, 32], strides = [1, 1]} : vector<1x128xf32> to vector<1x32xf32>
    %343 = vector.extract_strided_slice %331 {offsets = [0, 96], sizes = [1, 32], strides = [1, 1]} : vector<1x128xf32> to vector<1x32xf32>
    %cst_98 = arith.constant 1.000000e+00 : f32
    %344 = vector.broadcast %cst_98 : f32 to vector<1x32xf32>
    %345 = arith.addf %343, %344 : vector<1x32xf32>
    %cst_99 = arith.constant 5.000000e-01 : f32
    %346 = vector.broadcast %cst_99 : f32 to vector<1x32xf32>
    %347 = arith.mulf %346, %345 : vector<1x32xf32>
    %348 = arith.mulf %341, %293 : vector<1x32xf32>
    %349 = arith.mulf %336, %342 : vector<1x32xf32>
    %350 = arith.addf %348, %349 : vector<1x32xf32>
    %351 = math.tanh %350 : vector<1x32xf32>
    %352 = arith.mulf %347, %351 : vector<1x32xf32>
    %353 = arith.mulf %352, %3 : vector<1x32xf32>
    %cst_100 = arith.constant dense<0.000000e+00> : vector<1xf32>
    %354 = vector.multi_reduction <add>, %353, %cst_100 [1] : vector<1x32xf32> to vector<1xf32>
    %355 = vector.shape_cast %354 : vector<1xf32> to vector<1x1xf32>
    %356 = arith.addf %355, %4 : vector<1x1xf32>
    %c5 = arith.constant 5 : index
    %c0_101 = arith.constant 0 : index
    %357 = vector.load %arg4[%c5, %c0_101] : memref<8x1xf32, #tpu.memory_space<vmem>>, vector<1x1xf32>
    tpu.vector_store %arg4[%c5, %c0_101], %356 {strides = array<i32>} : memref<8x1xf32, #tpu.memory_space<vmem>>, vector<1x1xf32>,
    %358 = vector.extract_strided_slice %10 {offsets = [6, 0], sizes = [1, 128], strides = [1, 1]} : vector<8x128xf32> to vector<1x128xf32>
    %359 = arith.addf %358, %328 : vector<1x128xf32>
    %360 = math.tanh %359 : vector<1x128xf32>
    %361 = vector.extract_strided_slice %360 {offsets = [0, 0], sizes = [1, 32], strides = [1, 1]} : vector<1x128xf32> to vector<1x32xf32>
    %cst_102 = arith.constant 1.000000e+00 : f32
    %362 = vector.broadcast %cst_102 : f32 to vector<1x32xf32>
    %363 = arith.addf %361, %362 : vector<1x32xf32>
    %cst_103 = arith.constant 5.000000e-01 : f32
    %364 = vector.broadcast %cst_103 : f32 to vector<1x32xf32>
    %365 = arith.mulf %364, %363 : vector<1x32xf32>
    %366 = vector.extract_strided_slice %360 {offsets = [0, 32], sizes = [1, 32], strides = [1, 1]} : vector<1x128xf32> to vector<1x32xf32>
    %cst_104 = arith.constant 1.000000e+00 : f32
    %367 = vector.broadcast %cst_104 : f32 to vector<1x32xf32>
    %368 = arith.addf %366, %367 : vector<1x32xf32>
    %cst_105 = arith.constant 5.000000e-01 : f32
    %369 = vector.broadcast %cst_105 : f32 to vector<1x32xf32>
    %370 = arith.mulf %369, %368 : vector<1x32xf32>
    %371 = vector.extract_strided_slice %360 {offsets = [0, 64], sizes = [1, 32], strides = [1, 1]} : vector<1x128xf32> to vector<1x32xf32>
    %372 = vector.extract_strided_slice %360 {offsets = [0, 96], sizes = [1, 32], strides = [1, 1]} : vector<1x128xf32> to vector<1x32xf32>
    %cst_106 = arith.constant 1.000000e+00 : f32
    %373 = vector.broadcast %cst_106 : f32 to vector<1x32xf32>
    %374 = arith.addf %372, %373 : vector<1x32xf32>
    %cst_107 = arith.constant 5.000000e-01 : f32
    %375 = vector.broadcast %cst_107 : f32 to vector<1x32xf32>
    %376 = arith.mulf %375, %374 : vector<1x32xf32>
    %377 = arith.mulf %370, %322 : vector<1x32xf32>
    %378 = arith.mulf %365, %371 : vector<1x32xf32>
    %379 = arith.addf %377, %378 : vector<1x32xf32>
    %380 = math.tanh %379 : vector<1x32xf32>
    %381 = arith.mulf %376, %380 : vector<1x32xf32>
    %382 = tpu.concatenate %381, %352 in 1 : vector<1x32xf32>, vector<1x32xf32> -> vector<1x64xf32>
    %383 = arith.truncf %382 : vector<1x64xf32> to vector<1x64xbf16>
    %cst_108 = arith.constant dense<0.000000e+00> : vector<1x256xf32>
    %384 = tpu.matmul %383, %11, %cst_108 {dimension_numbers = #tpu.dot_dimension_numbers<[1], [0], [0], [1], [0, 0, 1, 1], [], []>} : vector<1x64xbf16>, vector<64x256xbf16>, vector<1x256xf32> -> vector<1x256xf32>
    %385 = vector.extract_strided_slice %384 {offsets = [0, 0], sizes = [1, 128], strides = [1, 1]} : vector<1x256xf32> to vector<1x128xf32>
    %386 = vector.extract_strided_slice %384 {offsets = [0, 128], sizes = [1, 128], strides = [1, 1]} : vector<1x256xf32> to vector<1x128xf32>
    %387 = arith.addf %386, %2 : vector<1x128xf32>
    %388 = math.tanh %387 : vector<1x128xf32>
    %389 = vector.extract_strided_slice %388 {offsets = [0, 0], sizes = [1, 32], strides = [1, 1]} : vector<1x128xf32> to vector<1x32xf32>
    %cst_109 = arith.constant 1.000000e+00 : f32
    %390 = vector.broadcast %cst_109 : f32 to vector<1x32xf32>
    %391 = arith.addf %389, %390 : vector<1x32xf32>
    %cst_110 = arith.constant 5.000000e-01 : f32
    %392 = vector.broadcast %cst_110 : f32 to vector<1x32xf32>
    %393 = arith.mulf %392, %391 : vector<1x32xf32>
    %394 = vector.extract_strided_slice %388 {offsets = [0, 32], sizes = [1, 32], strides = [1, 1]} : vector<1x128xf32> to vector<1x32xf32>
    %cst_111 = arith.constant 1.000000e+00 : f32
    %395 = vector.broadcast %cst_111 : f32 to vector<1x32xf32>
    %396 = arith.addf %394, %395 : vector<1x32xf32>
    %cst_112 = arith.constant 5.000000e-01 : f32
    %397 = vector.broadcast %cst_112 : f32 to vector<1x32xf32>
    %398 = arith.mulf %397, %396 : vector<1x32xf32>
    %399 = vector.extract_strided_slice %388 {offsets = [0, 64], sizes = [1, 32], strides = [1, 1]} : vector<1x128xf32> to vector<1x32xf32>
    %400 = vector.extract_strided_slice %388 {offsets = [0, 96], sizes = [1, 32], strides = [1, 1]} : vector<1x128xf32> to vector<1x32xf32>
    %cst_113 = arith.constant 1.000000e+00 : f32
    %401 = vector.broadcast %cst_113 : f32 to vector<1x32xf32>
    %402 = arith.addf %400, %401 : vector<1x32xf32>
    %cst_114 = arith.constant 5.000000e-01 : f32
    %403 = vector.broadcast %cst_114 : f32 to vector<1x32xf32>
    %404 = arith.mulf %403, %402 : vector<1x32xf32>
    %405 = arith.mulf %398, %350 : vector<1x32xf32>
    %406 = arith.mulf %393, %399 : vector<1x32xf32>
    %407 = arith.addf %405, %406 : vector<1x32xf32>
    %408 = math.tanh %407 : vector<1x32xf32>
    %409 = arith.mulf %404, %408 : vector<1x32xf32>
    %410 = arith.mulf %409, %3 : vector<1x32xf32>
    %cst_115 = arith.constant dense<0.000000e+00> : vector<1xf32>
    %411 = vector.multi_reduction <add>, %410, %cst_115 [1] : vector<1x32xf32> to vector<1xf32>
    %412 = vector.shape_cast %411 : vector<1xf32> to vector<1x1xf32>
    %413 = arith.addf %412, %4 : vector<1x1xf32>
    %c6 = arith.constant 6 : index
    %c0_116 = arith.constant 0 : index
    %414 = vector.load %arg4[%c6, %c0_116] : memref<8x1xf32, #tpu.memory_space<vmem>>, vector<1x1xf32>
    tpu.vector_store %arg4[%c6, %c0_116], %413 {strides = array<i32>} : memref<8x1xf32, #tpu.memory_space<vmem>>, vector<1x1xf32>,
    %415 = vector.extract_strided_slice %10 {offsets = [7, 0], sizes = [1, 128], strides = [1, 1]} : vector<8x128xf32> to vector<1x128xf32>
    %416 = arith.addf %415, %385 : vector<1x128xf32>
    %417 = math.tanh %416 : vector<1x128xf32>
    %418 = vector.extract_strided_slice %417 {offsets = [0, 0], sizes = [1, 32], strides = [1, 1]} : vector<1x128xf32> to vector<1x32xf32>
    %cst_117 = arith.constant 1.000000e+00 : f32
    %419 = vector.broadcast %cst_117 : f32 to vector<1x32xf32>
    %420 = arith.addf %418, %419 : vector<1x32xf32>
    %cst_118 = arith.constant 5.000000e-01 : f32
    %421 = vector.broadcast %cst_118 : f32 to vector<1x32xf32>
    %422 = arith.mulf %421, %420 : vector<1x32xf32>
    %423 = vector.extract_strided_slice %417 {offsets = [0, 32], sizes = [1, 32], strides = [1, 1]} : vector<1x128xf32> to vector<1x32xf32>
    %cst_119 = arith.constant 1.000000e+00 : f32
    %424 = vector.broadcast %cst_119 : f32 to vector<1x32xf32>
    %425 = arith.addf %423, %424 : vector<1x32xf32>
    %cst_120 = arith.constant 5.000000e-01 : f32
    %426 = vector.broadcast %cst_120 : f32 to vector<1x32xf32>
    %427 = arith.mulf %426, %425 : vector<1x32xf32>
    %428 = vector.extract_strided_slice %417 {offsets = [0, 64], sizes = [1, 32], strides = [1, 1]} : vector<1x128xf32> to vector<1x32xf32>
    %429 = vector.extract_strided_slice %417 {offsets = [0, 96], sizes = [1, 32], strides = [1, 1]} : vector<1x128xf32> to vector<1x32xf32>
    %cst_121 = arith.constant 1.000000e+00 : f32
    %430 = vector.broadcast %cst_121 : f32 to vector<1x32xf32>
    %431 = arith.addf %429, %430 : vector<1x32xf32>
    %cst_122 = arith.constant 5.000000e-01 : f32
    %432 = vector.broadcast %cst_122 : f32 to vector<1x32xf32>
    %433 = arith.mulf %432, %431 : vector<1x32xf32>
    %434 = arith.mulf %427, %379 : vector<1x32xf32>
    %435 = arith.mulf %422, %428 : vector<1x32xf32>
    %436 = arith.addf %434, %435 : vector<1x32xf32>
    %437 = math.tanh %436 : vector<1x32xf32>
    %438 = arith.mulf %433, %437 : vector<1x32xf32>
    %439 = tpu.concatenate %438, %409 in 1 : vector<1x32xf32>, vector<1x32xf32> -> vector<1x64xf32>
    %440 = arith.truncf %439 : vector<1x64xf32> to vector<1x64xbf16>
    %cst_123 = arith.constant dense<0.000000e+00> : vector<1x256xf32>
    %441 = tpu.matmul %440, %11, %cst_123 {dimension_numbers = #tpu.dot_dimension_numbers<[1], [0], [0], [1], [0, 0, 1, 1], [], []>} : vector<1x64xbf16>, vector<64x256xbf16>, vector<1x256xf32> -> vector<1x256xf32>
    %442 = vector.extract_strided_slice %441 {offsets = [0, 128], sizes = [1, 128], strides = [1, 1]} : vector<1x256xf32> to vector<1x128xf32>
    %443 = arith.addf %442, %2 : vector<1x128xf32>
    %444 = math.tanh %443 : vector<1x128xf32>
    %445 = vector.extract_strided_slice %444 {offsets = [0, 0], sizes = [1, 32], strides = [1, 1]} : vector<1x128xf32> to vector<1x32xf32>
    %cst_124 = arith.constant 1.000000e+00 : f32
    %446 = vector.broadcast %cst_124 : f32 to vector<1x32xf32>
    %447 = arith.addf %445, %446 : vector<1x32xf32>
    %cst_125 = arith.constant 5.000000e-01 : f32
    %448 = vector.broadcast %cst_125 : f32 to vector<1x32xf32>
    %449 = arith.mulf %448, %447 : vector<1x32xf32>
    %450 = vector.extract_strided_slice %444 {offsets = [0, 32], sizes = [1, 32], strides = [1, 1]} : vector<1x128xf32> to vector<1x32xf32>
    %cst_126 = arith.constant 1.000000e+00 : f32
    %451 = vector.broadcast %cst_126 : f32 to vector<1x32xf32>
    %452 = arith.addf %450, %451 : vector<1x32xf32>
    %cst_127 = arith.constant 5.000000e-01 : f32
    %453 = vector.broadcast %cst_127 : f32 to vector<1x32xf32>
    %454 = arith.mulf %453, %452 : vector<1x32xf32>
    %455 = vector.extract_strided_slice %444 {offsets = [0, 64], sizes = [1, 32], strides = [1, 1]} : vector<1x128xf32> to vector<1x32xf32>
    %456 = vector.extract_strided_slice %444 {offsets = [0, 96], sizes = [1, 32], strides = [1, 1]} : vector<1x128xf32> to vector<1x32xf32>
    %cst_128 = arith.constant 1.000000e+00 : f32
    %457 = vector.broadcast %cst_128 : f32 to vector<1x32xf32>
    %458 = arith.addf %456, %457 : vector<1x32xf32>
    %cst_129 = arith.constant 5.000000e-01 : f32
    %459 = vector.broadcast %cst_129 : f32 to vector<1x32xf32>
    %460 = arith.mulf %459, %458 : vector<1x32xf32>
    %461 = arith.mulf %454, %407 : vector<1x32xf32>
    %462 = arith.mulf %449, %455 : vector<1x32xf32>
    %463 = arith.addf %461, %462 : vector<1x32xf32>
    %464 = math.tanh %463 : vector<1x32xf32>
    %465 = arith.mulf %460, %464 : vector<1x32xf32>
    %466 = arith.mulf %465, %3 : vector<1x32xf32>
    %cst_130 = arith.constant dense<0.000000e+00> : vector<1xf32>
    %467 = vector.multi_reduction <add>, %466, %cst_130 [1] : vector<1x32xf32> to vector<1xf32>
    %468 = vector.shape_cast %467 : vector<1xf32> to vector<1x1xf32>
    %469 = arith.addf %468, %4 : vector<1x1xf32>
    %c7 = arith.constant 7 : index
    %c0_131 = arith.constant 0 : index
    %470 = vector.load %arg4[%c7, %c0_131] : memref<8x1xf32, #tpu.memory_space<vmem>>, vector<1x1xf32>
    tpu.vector_store %arg4[%c7, %c0_131], %469 {strides = array<i32>} : memref<8x1xf32, #tpu.memory_space<vmem>>, vector<1x1xf32>,
    return
  }
}

</mosaic_0001>

<bundles_post_ra>
// kernel: tpu_custom_call.1
= control target key start
LH: loop header
LB: loop body
LE: loop exit
PB: predicated region body
PF: predicated region fallthrough
CT: control target
= control target key end

     0   :  { %9 = vsyncpa [#allocation3], 0  ;;  %s1772_s0 = inlined_call_operand.hbm [shape: f32[8,300], index: 0, kind: input, shape index: {}]   ;;  %s1773_s1 = inlined_call_operand.hbm [shape: bf16[300,128], index: 1, kind: input, shape index: {}]   ;;  %s1774_s2 = inlined_call_operand.hbm [shape: bf16[64,256], index: 2, kind: input, shape index: {}]   ;;  %s1775_s3 = inlined_call_operand.hbm [shape: f32[4,128], index: 3, kind: input, shape index: {}]   ;;  %s1776_s4 = inlined_call_operand.vmem [shape: f32[8,1], index: 4, kind: output, shape index: {}]  }
   0x1   :  { %10 = vsyncpa [#allocation5], 0  ;;  %s27_s17 = sshll.u32 %s1773_s1, 4  ;;  %s28_s17 = int_to_ptr.hbm [resolvable:$true] %s27_s17 }
   0x2   :  { %11 = vsyncpa [#allocation8], 0  ;;  %s1459_s18 = smov [#allocation4]   ;;  %s17_s22 = sshll.u32 %s1772_s0, 4  ;;  %s18_s22 = int_to_ptr.hbm [resolvable:$true] %s17_s22 }
   0x3   :  { %s29_s19 = sshll.u32 %s1459_s18, 4  ;;  %s1460_s23 = smov 64   ;;  %s30_s19 = int_to_ptr.vmem [resolvable:$true] %s29_s19 }
   0x4   :  { %s1461_s24 = smov 4   ;;  %s1462_s25 = smov [#allocation2]  }
   0x5   :  { %35 = dma.hbm_to_vmem [thread:$0]  %s28_s17, 2432, %s30_s19, [#allocation5], %s1460_s23, %s1460_s23, %s1461_s24  }
   0x6   :  { %s19_s26 = sshll.u32 %s1462_s25, 4  ;;  %s40_s1 = sshll.u32 %s1774_s2, 4  ;;  %s20_s26 = int_to_ptr.vmem [resolvable:$true] %s19_s26  ;;  %s41_s1 = int_to_ptr.hbm [resolvable:$true] %s40_s1 }
   0x7   :  { %22 = dma.hbm_to_vmem [thread:$0]  %s18_s22, 384, %s20_s26, [#allocation3]  }
   0x8   :  { %s1463_s29 = smov [#allocation6]   ;;  %s54_s6 = sshll.u32 %s1775_s3, 4  ;;  %s55_s6 = int_to_ptr.hbm [resolvable:$true] %s54_s6 }
   0x9   :  { %s42_s30 = sshll.u32 %s1463_s29, 4  ;;  %s1464_s7 = smov 128   ;;  %s43_s30 = int_to_ptr.vmem [resolvable:$true] %s42_s30 }
   0xa   :  { %s1465_s8 = smov 8   ;;  %s1466_s9 = smov [#allocation7]  }
   0xb   :  { %48 = dma.hbm_to_vmem [thread:$0]  %s41_s1, 1024, %s43_s30, [#allocation5], %s1464_s7, %s1464_s7, %s1465_s8  }
   0xc   :  { %s56_s10 = sshll.u32 %s1466_s9, 4  ;;  %s57_s10 = int_to_ptr.vmem [resolvable:$true] %s56_s10 }
   0xd   :  { %59 = dma.hbm_to_vmem [thread:$0]  %s55_s6, 64, %s57_s10, [#allocation8]  }
   0xe   :  { %1453 = dma.done.wait [#allocation3], 384  }
   0xf   :  { %1454 = vsyncadd [#allocation3], 4294966912 }
  0x10   :  { %1455 = dma.done.wait [#allocation5], 3456  }
  0x11   :  { %1456 = vsyncadd [#allocation5], 4294963840 }
  0x12   :  { %1457 = dma.done.wait [#allocation8], 64  }
  0x13   :  { %1458 = vsyncadd [#allocation8], 4294967232  ;;  %v1263_v0 = vld [vmem:[#allocation4 + $0x38] sm:$0xff]  ;;  %v1262_v2 = vld [vmem:[#allocation4 + $0x30] sm:$0xff]  ;;  %vm240_vm0 = vcmask 1045504   ;;  %vm236_vm1 = vcmask 359424  }
  0x14   :  { %v1271_v1 = vld [vmem:[#allocation4 + $0x78] sm:$0xff]  ;;  %244 = vmatpush.bf16.msra.mxu0 %v1263_v0  ;;  %v1270_v3 = vld [vmem:[#allocation4 + $0x70] sm:$0xff]  ;;  %v1261_v8 = vld [vmem:[#allocation4 + $0x28] sm:$0xff]  ;;  %s1467_s2 = smov 32   ;;  %vm316_vm2 = vcmask 261120   ;;  %vm359_vm3 = vcmask 523264  }
  0x15   :  { %257 = vmatpush.bf16.msra.mxu1 %v1271_v1  ;;  %v1206_v4 = vld [vmem:[#allocation4 + $0x90] sm:$0xf]  ;;  %v1274_v5 = vld [vmem:[#allocation4 + $0x90] sm:$0x30]  ;;  %v1269_v9 = vld [vmem:[#allocation4 + $0x68] sm:$0xff]  ;;  %s1468_s3 = smov 96  }
  0x16   :  { %v1207_v6 = vor.u32 %v1274_v5, %v1206_v4  ;;  %v1273_v10 = vld [vmem:[#allocation4 + $0x88] sm:$0xff]  ;;  %v1260_v11 = vld [vmem:[#allocation4 + $0x20] sm:$0xff]  ;;  %v80_v14 = vld [vmem:[#allocation2 + $0x10] sm:$0xff]  ;;  %vm422_vm4 = vcmask 253952   ;;  %vm429_vm5 = vcmask 0  }
  0x17   :  { %v1268_v12 = vld [vmem:[#allocation4 + $0x60] sm:$0xff]  ;;  %v1259_v15 = vld [vmem:[#allocation4 + $0x18] sm:$0xff]  ;;  %v83_v17 = vpack.c.bf16 %v80_v14, %v80_v14  ;;  %v1258_v18 = vld [vmem:[#allocation4 + $0x10] sm:$0xff] }
  0x18   :  { %v242_v7 = vsel %vm240_vm0, %v1207_v6, 0  ;;  %245 = vmatpush.bf16.msra.mxu0 %v1262_v2  ;;  %v1272_v13 = vld [vmem:[#allocation4 + $0x80] sm:$0xff]  ;;  %v1267_v16 = vld [vmem:[#allocation4 + $0x58] sm:$0xff]  ;;  %v1266_v19 = vld [vmem:[#allocation4 + $0x50] sm:$0xff] }
  0x19   :  { %258 = vmatpush.bf16.msra.mxu1 %v1270_v3  ;;  %275 = vmatpush.bf16.msra.mxu2 %v242_v7  ;;  %v1257_v20 = vld [vmem:[#allocation4 + $0x8] sm:$0xff]  ;;  %v1256_v22 = vld [vmem:[#allocation4] sm:$0xff]  ;;  %v79_v25 = vld [vmem:[#allocation2 + $0x8] sm:$0xff] }
  0x1a   :  { %v1265_v21 = vld [vmem:[#allocation4 + $0x48] sm:$0xff]  ;;  %v1264_v23 = vld [vmem:[#allocation4 + $0x40] sm:$0xff]  ;;  %v82_v27 = vpack.c.bf16 %v79_v25, %v79_v25  ;;  %v1508_v29 = vld [vmem:[#allocation7] sm:$0xf] }
  0x1b   :  { %v78_v24 = vld [vmem:[#allocation2] sm:$0xff]  ;;  %v122_v30 = vperm.slane %v1508_v29, 0  ;;  %v1237_v49 = vld [vmem:[#allocation6 + $0x38] sm:$0xf0]  ;;  %v1282_v52 = vld [vmem:[#allocation6 + $0x34] sm:$0xf0] }
  0x1c   :  { %246 = vmatpush.bf16.msra.mxu0 %v1261_v8  ;;  %v81_v26 = vpack.c.bf16 %v78_v24, %v78_v24  ;;  %v1281_v48 = vld [vmem:[#allocation6 + $0x34] sm:$0xf]  ;;  %v1235_v50 = vld [vmem:[#allocation6 + $0x30] sm:$0xf]  ;;  %v1279_v53 = vld [vmem:[#allocation6 + $0x24] sm:$0xf] }
  0x1d   :  { %259 = vmatpush.bf16.msra.mxu1 %v1269_v9  ;;  %276 = vmatpush.bf16.msra.mxu2 %v1273_v10  ;;  %v1520_v51 = vor.u32 %v1281_v48, %v1237_v49  ;;  %v1229_v54 = vld [vmem:[#allocation6 + $0x28] sm:$0xf0]  ;;  %v1522_v55 = vor.u32 %v1282_v52, %v1235_v50  ;;  %v1227_v56 = vld [vmem:[#allocation6 + $0x20] sm:$0xf]  ;;  %v1280_v57 = vld [vmem:[#allocation6 + $0x24] sm:$0xf0] }
  0x1e   :  { %v1525_v58 = vor.u32 %v1279_v53, %v1229_v54  ;;  %v1529_v59 = vor.u32 %v1280_v57, %v1227_v56  ;;  %v1277_v60 = vld [vmem:[#allocation6 + $0x14] sm:$0xf]  ;;  %v1221_v61 = vld [vmem:[#allocation6 + $0x18] sm:$0xf0]  ;;  %v1219_v62 = vld [vmem:[#allocation6 + $0x10] sm:$0xf] }
  0x1f   :  { %367 = vmatpush.bf16.msra.mxu3 %v1522_v55  ;;  %v1278_v63 = vld [vmem:[#allocation6 + $0x14] sm:$0xf0]  ;;  %v1533_v0 = vor.u32 %v1277_v60, %v1221_v61  ;;  %v1275_v2 = vld [vmem:[#allocation6 + $0x4] sm:$0xf]  ;;  %v1213_v3 = vld [vmem:[#allocation6 + $0x8] sm:$0xf0] }
  0x20   :  { %247 = vmatpush.bf16.msra.mxu0 %v1260_v11  ;;  %v1537_v1 = vor.u32 %v1278_v63, %v1219_v62  ;;  %v1541_v4 = vor.u32 %v1275_v2, %v1213_v3  ;;  %v1211_v7 = vld [vmem:[#allocation6] sm:$0xf]  ;;  %v1276_v8 = vld [vmem:[#allocation6 + $0x4] sm:$0xf0] }
  0x21   :  { %260 = vmatpush.bf16.msra.mxu1 %v1268_v12  ;;  %277 = vmatpush.bf16.msra.mxu2 %v1272_v13  ;;  %v1557_v9 = vor.u32 %v1276_v8, %v1211_v7  ;;  %v1581_v13 = vrot.slane %v1508_v29, 1 }
  0x23   :  { %368 = vmatpush.bf16.msra.mxu3 %v1529_v59 }
  0x24   :  { %248 = vmatpush.bf16.msra.mxu0 %v1259_v15  ;;  %1208 = vmatmul.msk.bf16.vlgmr.msra.gmra.mxu2 %vm236_vm1, %v83_v17 }
  0x25   :  { %261 = vmatpush.bf16.msra.mxu1 %v1267_v16  ;;  %380 = vmatpush.bf16.msrb.mxu2 %v1520_v51 }
  0x27   :  { %369 = vmatpush.bf16.msra.mxu3 %v1537_v1 }
  0x28   :  { %249 = vmatpush.bf16.msra.mxu0 %v1258_v18 }
  0x29   :  { %262 = vmatpush.bf16.msra.mxu1 %v1266_v19  ;;  %381 = vmatpush.bf16.msrb.mxu2 %v1525_v58 }
  0x2b   :  { %370 = vmatpush.bf16.msra.mxu3 %v1557_v9 }
  0x2c   :  { %250 = vmatpush.bf16.msra.mxu0 %v1257_v20 }
  0x2d   :  { %263 = vmatpush.bf16.msra.mxu1 %v1265_v21  ;;  %382 = vmatpush.bf16.msrb.mxu2 %v1533_v0 }
  0x2f   :  { %479 = vmatpush.bf16.msrb.mxu3 %v1522_v55 }
  0x30   :  { %251 = vmatpush.bf16.msra.mxu0 %v1256_v22 }
  0x31   :  { %264 = vmatpush.bf16.msra.mxu1 %v1264_v23  ;;  %383 = vmatpush.bf16.msrb.mxu2 %v1541_v4 }
  0x33   :  { %252 = vmatmul.bf16.vlgmr.msra.gmra.mxu0 %v81_v26  ;;  %480 = vmatpush.bf16.msrb.mxu3 %v1529_v59 }
  0x34   :  { %265 = vmatmul.bf16.vlgmr.msra.gmra.mxu1 %v82_v27  ;;  %579 = vmatpush.bf16.msrb.mxu0 %v1522_v55 }
  0x35   :  { %592 = vmatpush.bf16.msrb.mxu1 %v1520_v51  ;;  %492 = vmatpush.bf16.msra.mxu2 %v1520_v51 }
  0x37   :  { %481 = vmatpush.bf16.msrb.mxu3 %v1537_v1 }
  0x38   :  { %580 = vmatpush.bf16.msrb.mxu0 %v1529_v59 }
  0x39   :  { %593 = vmatpush.bf16.msrb.mxu1 %v1525_v58  ;;  %493 = vmatpush.bf16.msra.mxu2 %v1525_v58 }
  0x3b   :  { %482 = vmatpush.bf16.msrb.mxu3 %v1557_v9 }
  0x3c   :  { %581 = vmatpush.bf16.msrb.mxu0 %v1537_v1 }
  0x3d   :  { %594 = vmatpush.bf16.msrb.mxu1 %v1533_v0  ;;  %494 = vmatpush.bf16.msra.mxu2 %v1533_v0 }
  0x40   :  { %582 = vmatpush.bf16.msrb.mxu0 %v1557_v9 }
  0x41   :  { %595 = vmatpush.bf16.msrb.mxu1 %v1541_v4  ;;  %495 = vmatpush.bf16.msra.mxu2 %v1541_v4 }
  0x44   :  { %781 = vmatpush.bf16.msra.mxu0 %v1522_v55 }
  0x45   :  { %794 = vmatpush.bf16.msra.mxu1 %v1520_v51 }
  0x48   :  { %782 = vmatpush.bf16.msra.mxu0 %v1529_v59 }
  0x49   :  { %795 = vmatpush.bf16.msra.mxu1 %v1525_v58 }
  0x4c   :  { %783 = vmatpush.bf16.msra.mxu0 %v1537_v1 }
  0x4d   :  { %796 = vmatpush.bf16.msra.mxu1 %v1533_v0 }
  0x50   :  { %784 = vmatpush.bf16.msra.mxu0 %v1557_v9 }
  0x51   :  { %797 = vmatpush.bf16.msra.mxu1 %v1541_v4 }
  0xa7   :  { %v279_v28 = vpop.f32.mrf.mxu2 }
  0xaf   :  { %v281_v34 = vpop.f32.mrf.mxu2 }
  0xb0   :  { %v253_v31 = vpop.f32.mrf.mxu0 }
  0xb1   :  { %v266_v32 = vpop.f32.mrf.mxu1  ;;  %v254_v33 = vadd.f32 %v253_v31, %v122_v30 }
  0xb3   :  { %v267_v35 = vadd.f32 %v266_v32, %v254_v33 }
  0xb5   :  { %v1511_v36 = vadd.f32 %v279_v28, %v267_v35 }
  0xb7   :  { %1293 = vtanh.f32 %v1511_v36 }
  0xb8   :  { %v255_v37 = vpop.f32.mrf.mxu0 }
  0xb9   :  { %v268_v38 = vpop.f32.mrf.mxu1 }
  0xbd   :  { %v1294_v39 = vpop.eup %1293 }
  0xbe   :  { %297 = vrot.lane.b32.xlu0 %v1294_v39, %s1460_s23  ;;  %v293_v40 = vadd.f32 1.0, %v1294_v39 }
  0xc0   :  { %v294_v41 = vmul.f32 0.5, %v293_v40 }
  0xc2   :  { %v295_v44 = vmul.f32 0.0, %v294_v41 }
 0x130   :  { %v298_v42 = vpop.permute.xlu0 %297 }
 0x131   :  { %v300_v43 = vmul.f32 %v298_v42, %v294_v41 }
 0x133   :  { %302 = vrot.lane.b32.xlu0 %v300_v43, %s1467_s2 }
 0x1a5   :  { %v303_v45 = vpop.permute.xlu0 %302 }
 0x1a6   :  { %v1516_v46 = vadd.f32 %v303_v45, %v295_v44 }
 0x1a8   :  { %1295 = vtanh.f32 %v1516_v46  ;;  %v439_v35 = vrot.slane %v1516_v46, 7 }
 0x1ae   :  { %v1296_v47 = vpop.eup %1295 }
 0x1af   :  { %308 = vrot.lane.b32.xlu1 %v1296_v47, %s1460_s23 }
 0x221   :  { %v309_v5 = vpop.permute.xlu1 %308 }
 0x222   :  { %v311_v6 = vmul.f32 %v309_v5, %v294_v41 }
 0x224   :  { %313 = vrot.lane.b32.xlu1 %v311_v6, %s1467_s2 }
 0x296   :  { %v314_v10 = vpop.permute.xlu1 %313 }
 0x297   :  { %v317_v11 = vsel %vm316_vm2, %v314_v10, 0.0 }
 0x298   :  { %v318_v12 = vpack.c.bf16 %v317_v11, %v317_v11 }
 0x29a   :  { %1241 = vmatmul.msk.bf16.vlgmr.msra.gmra.mxu3 %vm359_vm3, %v318_v12  ;;  %1242 = vmatmul.msk.bf16.vlgmr.msrb.gmra.mxu2 %vm359_vm3, %v318_v12 }
 0x29b   :  { %681 = vmatpush.bf16.msra.mxu3 %v1522_v55  ;;  %694 = vmatpush.bf16.msrb.mxu2 %v1520_v51 }
 0x29f   :  { %682 = vmatpush.bf16.msra.mxu3 %v1529_v59  ;;  %695 = vmatpush.bf16.msrb.mxu2 %v1525_v58 }
 0x2a3   :  { %683 = vmatpush.bf16.msra.mxu3 %v1537_v1  ;;  %696 = vmatpush.bf16.msrb.mxu2 %v1533_v0 }
 0x2a7   :  { %684 = vmatpush.bf16.msra.mxu3 %v1557_v9  ;;  %697 = vmatpush.bf16.msrb.mxu2 %v1541_v4 }
 0x31d   :  { %v372_v14 = vpop.f32.mrf.mxu3  ;;  %v385_v15 = vpop.f32.mrf.mxu2 }
 0x31e   :  { %v392_v16 = vadd.f32 %v1581_v13, %v385_v15  ;;  %v432_v17 = vrot.slane %v372_v14, 7 }
 0x320   :  { %1297 = vtanh.f32 %v392_v16  ;;  %v434_v18 = vadd.f32 %v432_v17, %v1511_v36 }
 0x322   :  { %1299 = vtanh.f32 %v434_v18 }
 0x325   :  { %v374_v19 = vpop.f32.mrf.mxu3  ;;  %v387_v20 = vpop.f32.mrf.mxu2 }
 0x326   :  { %v1298_v21 = vpop.eup %1297 }
 0x327   :  { %398 = vrot.lane.b32.xlu2 %v1298_v21, %s1460_s23  ;;  %v394_v23 = vadd.f32 1.0, %v1298_v21 }
 0x328   :  { %v1300_v22 = vpop.eup %1299 }
 0x329   :  { %v395_v24 = vmul.f32 0.5, %v394_v23  ;;  %v436_v27 = vadd.f32 1.0, %v1300_v22 }
 0x32b   :  { %v437_v28 = vmul.f32 0.5, %v436_v27  ;;  %v396_v32 = vmul.f32 0.0, %v395_v24 }
 0x32d   :  { %v441_v37 = vmul.f32 %v439_v35, %v437_v28 }
 0x32f   :  { %443 = vrot.lane.b32.xlu2 %v1300_v22, %s1460_s23 }
 0x381   :  { %v399_v25 = vpop.permute.xlu2 %398 }
 0x382   :  { %v401_v26 = vmul.f32 %v399_v25, %v395_v24 }
 0x384   :  { %403 = vrot.lane.b32.xlu0 %v401_v26, %s1467_s2 }
 0x389   :  { %v444_v30 = vpop.permute.xlu2 %443 }
 0x38a   :  { %v446_v31 = vmul.f32 %v444_v30, %v437_v28 }
 0x38c   :  { %448 = vrot.lane.b32.xlu1 %v446_v31, %s1467_s2 }
 0x3f6   :  { %v404_v33 = vpop.permute.xlu0 %403 }
 0x3f7   :  { %v406_v34 = vadd.f32 %v404_v33, %v396_v32 }
 0x3f9   :  { %1301 = vtanh.f32 %v406_v34 }
 0x3fe   :  { %v449_v38 = vpop.permute.xlu1 %448 }
 0x3ff   :  { %v1302_v39 = vpop.eup %1301  ;;  %v451_v40 = vadd.f32 %v449_v38, %v441_v37 }
 0x400   :  { %409 = vrot.lane.b32.xlu2 %v1302_v39, %s1460_s23 }
 0x401   :  { %1303 = vtanh.f32 %v451_v40  ;;  %v540_v18 = vrot.slane %v451_v40, 7 }
 0x407   :  { %v1304_v41 = vpop.eup %1303 }
 0x408   :  { %454 = vrot.lane.b32.xlu0 %v1304_v41, %s1460_s23 }
 0x45a   :  { %v410_v42 = vpop.permute.xlu2 %409 }
 0x45b   :  { %v1592_v43 = vmul.f32 %v410_v42, %v395_v24 }
 0x45d   :  { %v463_v44 = vrot.slane %v1592_v43, 7 }
 0x45f   :  { %464 = vrot.lane.b32.xlu2 %v463_v44, %s1460_s23 }
 0x47a   :  { %v455_v45 = vpop.permute.xlu0 %454 }
 0x47b   :  { %v457_v47 = vmul.f32 %v455_v45, %v437_v28 }
 0x47d   :  { %459 = vrot.lane.b32.xlu1 %v457_v47, %s1467_s2 }
 0x4b9   :  { %v465_v46 = vpop.permute.xlu2 %464 }
 0x4ef   :  { %v460_v48 = vpop.permute.xlu1 %459 }
 0x4f0   :  { %v467_v49 = vsel %vm316_vm2, %v460_v48, %v465_v46 }
 0x4f1   :  { %v468_v50 = vpack.c.bf16 %v467_v49, %v467_v49 }
 0x4f3   :  { %v470_v52 = vshrl.u32 %v468_v50, 16 }
 0x4f5   :  { %1243 = vmatmul.msk.bf16.vlgmr.msrb.gmra.mxu3 %vm359_vm3, %v470_v52  ;;  %1244 = vmatmul.msk.bf16.vlgmr.msra.gmra.mxu2 %vm359_vm3, %v470_v52 }
 0x4f6   :  { %896 = vmatpush.bf16.msra.mxu2 %v1520_v51  ;;  %883 = vmatpush.bf16.msrb.mxu3 %v1522_v55 }
 0x4fa   :  { %897 = vmatpush.bf16.msra.mxu2 %v1525_v58  ;;  %884 = vmatpush.bf16.msrb.mxu3 %v1529_v59 }
 0x4fe   :  { %898 = vmatpush.bf16.msra.mxu2 %v1533_v0  ;;  %885 = vmatpush.bf16.msrb.mxu3 %v1537_v1 }
 0x502   :  { %899 = vmatpush.bf16.msra.mxu2 %v1541_v4  ;;  %886 = vmatpush.bf16.msrb.mxu3 %v1557_v9 }
 0x578   :  { %v484_v53 = vpop.f32.mrf.mxu3  ;;  %v497_v54 = vpop.f32.mrf.mxu2 }
 0x579   :  { %v533_v56 = vrot.slane %v484_v53, 6  ;;  %v501_v57 = vadd.f32 %v497_v54, %v1581_v13 }
 0x57b   :  { %v535_v60 = vadd.f32 %v533_v56, %v1511_v36  ;;  %1305 = vtanh.f32 %v501_v57 }
 0x57d   :  { %1307 = vtanh.f32 %v535_v60 }
 0x580   :  { %v486_v61 = vpop.f32.mrf.mxu3  ;;  %v499_v62 = vpop.f32.mrf.mxu2 }
 0x581   :  { %v1306_v63 = vpop.eup %1305 }
 0x582   :  { %507 = vrot.lane.b32.xlu0 %v1306_v63, %s1460_s23  ;;  %v503_v3 = vadd.f32 1.0, %v1306_v63 }
 0x583   :  { %v1308_v2 = vpop.eup %1307 }
 0x584   :  { %544 = vrot.lane.b32.xlu1 %v1308_v2, %s1460_s23  ;;  %v537_v5 = vadd.f32 1.0, %v1308_v2  ;;  %v504_v6 = vmul.f32 0.5, %v503_v3 }
 0x586   :  { %v538_v10 = vmul.f32 0.5, %v537_v5  ;;  %v505_v14 = vmul.f32 %v504_v6, %v406_v34 }
 0x588   :  { %v542_v19 = vmul.f32 %v540_v18, %v538_v10 }
 0x5f4   :  { %v508_v7 = vpop.permute.xlu0 %507 }
 0x5f5   :  { %v510_v8 = vmul.f32 %v508_v7, %v504_v6 }
 0x5f6   :  { %v545_v11 = vpop.permute.xlu1 %544 }
 0x5f7   :  { %v547_v12 = vmul.f32 %v545_v11, %v538_v10  ;;  %512 = vrot.lane.b32.xlu2 %v510_v8, %s1467_s2 }
 0x5f9   :  { %549 = vrot.lane.b32.xlu0 %v547_v12, %s1467_s2 }
 0x651   :  { %v513_v15 = vpop.permute.xlu2 %512 }
 0x652   :  { %v515_v16 = vadd.f32 %v513_v15, %v505_v14 }
 0x654   :  { %1309 = vtanh.f32 %v515_v16 }
 0x65a   :  { %v1310_v17 = vpop.eup %1309 }
 0x65b   :  { %518 = vrot.lane.b32.xlu1 %v1310_v17, %s1460_s23 }
 0x66b   :  { %v550_v20 = vpop.permute.xlu0 %549 }
 0x66c   :  { %v552_v21 = vadd.f32 %v550_v20, %v542_v19 }
 0x66e   :  { %1311 = vtanh.f32 %v552_v21  ;;  %v640_v49 = vrot.slane %v552_v21, 7 }
 0x674   :  { %v1312_v22 = vpop.eup %1311 }
 0x675   :  { %555 = vrot.lane.b32.xlu2 %v1312_v22, %s1460_s23 }
 0x6cd   :  { %v519_v23 = vpop.permute.xlu1 %518 }
 0x6ce   :  { %v1616_v24 = vmul.f32 %v519_v23, %v504_v6 }
 0x6cf   :  { %v556_v25 = vpop.permute.xlu2 %555 }
 0x6d0   :  { %v558_v26 = vmul.f32 %v556_v25, %v538_v10  ;;  %v564_v27 = vrot.slane %v1616_v24, 6 }
 0x6d2   :  { %565 = vrot.lane.b32.xlu1 %v564_v27, %s1460_s23  ;;  %560 = vrot.lane.b32.xlu0 %v558_v26, %s1467_s2 }
 0x744   :  { %v566_v28 = vpop.permute.xlu1 %565  ;;  %v561_v30 = vpop.permute.xlu0 %560 }
 0x745   :  { %v568_v31 = vsel %vm316_vm2, %v561_v30, %v566_v28 }
 0x746   :  { %v569_v32 = vpack.c.bf16 %v568_v31, %v568_v31 }
 0x748   :  { %v571_v33 = vrot.slane %v569_v32, 1 }
 0x74a   :  { %1245 = vmatmul.msk.bf16.vlgmr.msrb.gmra.mxu0 %vm359_vm3, %v571_v33  ;;  %1246 = vmatmul.msk.bf16.vlgmr.msrb.gmra.mxu1 %vm359_vm3, %v571_v33 }
 0x74b   :  { %983 = vmatpush.bf16.msrb.mxu0 %v1522_v55  ;;  %996 = vmatpush.bf16.msrb.mxu1 %v1520_v51 }
 0x74f   :  { %984 = vmatpush.bf16.msrb.mxu0 %v1529_v59  ;;  %997 = vmatpush.bf16.msrb.mxu1 %v1525_v58 }
 0x753   :  { %985 = vmatpush.bf16.msrb.mxu0 %v1537_v1  ;;  %998 = vmatpush.bf16.msrb.mxu1 %v1533_v0 }
 0x757   :  { %986 = vmatpush.bf16.msrb.mxu0 %v1557_v9  ;;  %999 = vmatpush.bf16.msrb.mxu1 %v1541_v4 }
 0x7c7   :  { %v584_v34 = vpop.f32.mrf.mxu0  ;;  %v597_v35 = vpop.f32.mrf.mxu1 }
 0x7c8   :  { %v633_v37 = vrot.slane %v584_v34, 5  ;;  %v601_v38 = vadd.f32 %v597_v35, %v1581_v13 }
 0x7ca   :  { %v635_v55 = vadd.f32 %v633_v37, %v1511_v36  ;;  %1313 = vtanh.f32 %v601_v38 }
 0x7cc   :  { %1315 = vtanh.f32 %v635_v55 }
 0x7cf   :  { %v586_v59 = vpop.f32.mrf.mxu0  ;;  %v599_v39 = vpop.f32.mrf.mxu1 }
 0x7d0   :  { %v1314_v40 = vpop.eup %1313 }
 0x7d1   :  { %607 = vrot.lane.b32.xlu2 %v1314_v40, %s1460_s23  ;;  %v603_v9 = vadd.f32 1.0, %v1314_v40 }
 0x7d2   :  { %v1316_v1 = vpop.eup %1315 }
 0x7d3   :  { %644 = vrot.lane.b32.xlu0 %v1316_v1, %s1460_s23  ;;  %v604_v41 = vmul.f32 0.5, %v603_v9  ;;  %v637_v45 = vadd.f32 1.0, %v1316_v1 }
 0x7d5   :  { %v638_v47 = vmul.f32 0.5, %v637_v45  ;;  %v605_v50 = vmul.f32 %v604_v41, %v515_v16 }
 0x7d7   :  { %v642_v54 = vmul.f32 %v640_v49, %v638_v47 }
 0x82b   :  { %v608_v42 = vpop.permute.xlu2 %607 }
 0x82c   :  { %v610_v44 = vmul.f32 %v608_v42, %v604_v41 }
 0x82e   :  { %612 = vrot.lane.b32.xlu1 %v610_v44, %s1467_s2 }
 0x845   :  { %v645_v46 = vpop.permute.xlu0 %644 }
 0x846   :  { %v647_v48 = vmul.f32 %v645_v46, %v638_v47 }
 0x848   :  { %649 = vrot.lane.b32.xlu2 %v647_v48, %s1467_s2 }
 0x8a0   :  { %v613_v52 = vpop.permute.xlu1 %612 }
 0x8a1   :  { %v615_v53 = vadd.f32 %v613_v52, %v605_v50 }
 0x8a2   :  { %v650_v56 = vpop.permute.xlu2 %649 }
 0x8a3   :  { %1317 = vtanh.f32 %v615_v53  ;;  %v652_v57 = vadd.f32 %v650_v56, %v642_v54 }
 0x8a5   :  { %1319 = vtanh.f32 %v652_v57  ;;  %v742_v28 = vrot.slane %v652_v57, 7 }
 0x8a9   :  { %v1318_v60 = vpop.eup %1317 }
 0x8aa   :  { %618 = vrot.lane.b32.xlu0 %v1318_v60, %s1460_s23 }
 0x8ab   :  { %v1320_v61 = vpop.eup %1319 }
 0x8ac   :  { %655 = vrot.lane.b32.xlu1 %v1320_v61, %s1460_s23 }
 0x91c   :  { %v619_v62 = vpop.permute.xlu0 %618 }
 0x91d   :  { %v1640_v63 = vmul.f32 %v619_v62, %v604_v41 }
 0x91e   :  { %v656_v2 = vpop.permute.xlu1 %655 }
 0x91f   :  { %v658_v3 = vmul.f32 %v656_v2, %v638_v47  ;;  %v664_v5 = vrot.slane %v1640_v63, 5 }
 0x921   :  { %665 = vrot.lane.b32.xlu0 %v664_v5, %s1460_s23  ;;  %660 = vrot.lane.b32.xlu2 %v658_v3, %s1467_s2 }
 0x97b   :  { %v661_v6 = vpop.permute.xlu2 %660 }
 0x993   :  { %v666_v7 = vpop.permute.xlu0 %665 }
 0x994   :  { %v668_v8 = vsel %vm316_vm2, %v661_v6, %v666_v7 }
 0x995   :  { %v669_v10 = vpack.c.bf16 %v668_v8, %v668_v8 }
 0x997   :  { %v671_v11 = vshrl.u32 %v669_v10, 16 }
 0x999   :  { %v673_v12 = vrot.slane %v671_v11, 1 }
 0x99b   :  { %1247 = vmatmul.msk.bf16.vlgmr.msra.gmra.mxu3 %vm359_vm3, %v673_v12  ;;  %1248 = vmatmul.msk.bf16.vlgmr.msrb.gmra.mxu2 %vm359_vm3, %v673_v12 }
 0x99c   :  { %1085 = vmatpush.bf16.msra.mxu3 %v1520_v51 }
 0x9a0   :  { %1086 = vmatpush.bf16.msra.mxu3 %v1525_v58 }
 0x9a4   :  { %1087 = vmatpush.bf16.msra.mxu3 %v1533_v0 }
 0x9a8   :  { %1088 = vmatpush.bf16.msra.mxu3 %v1541_v4 }
 0xa1e   :  { %v686_v14 = vpop.f32.mrf.mxu3  ;;  %v699_v15 = vpop.f32.mrf.mxu2 }
 0xa1f   :  { %v735_v16 = vrot.slane %v686_v14, 4  ;;  %v703_v17 = vadd.f32 %v699_v15, %v1581_v13 }
 0xa21   :  { %v737_v18 = vadd.f32 %v735_v16, %v1511_v36  ;;  %1321 = vtanh.f32 %v703_v17 }
 0xa23   :  { %1323 = vtanh.f32 %v737_v18 }
 0xa26   :  { %v688_v19 = vpop.f32.mrf.mxu3  ;;  %v701_v20 = vpop.f32.mrf.mxu2 }
 0xa27   :  { %v1322_v21 = vpop.eup %1321 }
 0xa28   :  { %709 = vrot.lane.b32.xlu1 %v1322_v21, %s1460_s23  ;;  %v705_v23 = vadd.f32 1.0, %v1322_v21 }
 0xa29   :  { %v1324_v51 = vpop.eup %1323 }
 0xa2a   :  { %746 = vrot.lane.b32.xlu2 %v1324_v51, %s1460_s23  ;;  %v739_v58 = vadd.f32 1.0, %v1324_v51  ;;  %v706_v25 = vmul.f32 0.5, %v705_v23 }
 0xa2c   :  { %v740_v0 = vmul.f32 0.5, %v739_v58  ;;  %v707_v34 = vmul.f32 %v706_v25, %v615_v53 }
 0xa2e   :  { %v744_v30 = vmul.f32 %v742_v28, %v740_v0 }
 0xa84   :  { %v747_v4 = vpop.permute.xlu2 %746 }
 0xa85   :  { %v749_v22 = vmul.f32 %v747_v4, %v740_v0 }
 0xa87   :  { %751 = vrot.lane.b32.xlu1 %v749_v22, %s1467_s2 }
 0xa9a   :  { %v710_v26 = vpop.permute.xlu1 %709 }
 0xa9b   :  { %v712_v27 = vmul.f32 %v710_v26, %v706_v25 }
 0xa9d   :  { %714 = vrot.lane.b32.xlu0 %v712_v27, %s1467_s2 }
 0xaf9   :  { %v752_v31 = vpop.permute.xlu1 %751 }
 0xafa   :  { %v754_v32 = vadd.f32 %v752_v31, %v744_v30 }
 0xafc   :  { %1325 = vtanh.f32 %v754_v32  ;;  %v842_v12 = vrot.slane %v754_v32, 7 }
 0xb02   :  { %v1326_v33 = vpop.eup %1325 }
 0xb03   :  { %757 = vrot.lane.b32.xlu0 %v1326_v33, %s1460_s23 }
 0xb0f   :  { %v715_v35 = vpop.permute.xlu0 %714 }
 0xb10   :  { %v717_v37 = vadd.f32 %v715_v35, %v707_v34 }
 0xb12   :  { %1327 = vtanh.f32 %v717_v37 }
 0xb18   :  { %v1328_v38 = vpop.eup %1327 }
 0xb19   :  { %720 = vrot.lane.b32.xlu2 %v1328_v38, %s1460_s23 }
 0xb73   :  { %v721_v55 = vpop.permute.xlu2 %720 }
 0xb74   :  { %v1660_v59 = vmul.f32 %v721_v55, %v706_v25 }
 0xb75   :  { %v758_v39 = vpop.permute.xlu0 %757 }
 0xb76   :  { %v760_v40 = vmul.f32 %v758_v39, %v740_v0  ;;  %v766_v1 = vrot.slane %v1660_v59, 4 }
 0xb78   :  { %767 = vrot.lane.b32.xlu2 %v766_v1, %s1460_s23  ;;  %762 = vrot.lane.b32.xlu1 %v760_v40, %s1467_s2 }
 0xbd2   :  { %v768_v9 = vpop.permute.xlu2 %767 }
 0xbea   :  { %v763_v41 = vpop.permute.xlu1 %762 }
 0xbeb   :  { %v770_v42 = vsel %vm316_vm2, %v763_v41, %v768_v9 }
 0xbec   :  { %v771_v44 = vpack.c.bf16 %v770_v42, %v770_v42 }
 0xbee   :  { %v773_v45 = vrot.slane %v771_v44, 2 }
 0xbf0   :  { %1249 = vmatmul.msk.bf16.vlgmr.msra.gmra.mxu0 %vm359_vm3, %v773_v45  ;;  %1250 = vmatmul.msk.bf16.vlgmr.msra.gmra.mxu1 %vm359_vm3, %v773_v45 }
 0xc6d   :  { %v786_v47 = vpop.f32.mrf.mxu0  ;;  %v799_v46 = vpop.f32.mrf.mxu1 }
 0xc6e   :  { %v835_v48 = vrot.slane %v786_v47, 3  ;;  %v803_v49 = vadd.f32 %v799_v46, %v1581_v13 }
 0xc70   :  { %v837_v50 = vadd.f32 %v835_v48, %v1511_v36  ;;  %1329 = vtanh.f32 %v803_v49 }
 0xc72   :  { %1331 = vtanh.f32 %v837_v50 }
 0xc75   :  { %v788_v52 = vpop.f32.mrf.mxu0  ;;  %v801_v53 = vpop.f32.mrf.mxu1 }
 0xc76   :  { %v1330_v54 = vpop.eup %1329 }
 0xc77   :  { %809 = vrot.lane.b32.xlu0 %v1330_v54, %s1460_s23  ;;  %v805_v57 = vadd.f32 1.0, %v1330_v54 }
 0xc78   :  { %v1332_v56 = vpop.eup %1331 }
 0xc79   :  { %846 = vrot.lane.b32.xlu1 %v1332_v56, %s1460_s23  ;;  %v839_v60 = vadd.f32 1.0, %v1332_v56  ;;  %v806_v61 = vmul.f32 0.5, %v805_v57 }
 0xc7b   :  { %v840_v3 = vmul.f32 0.5, %v839_v60  ;;  %v807_v7 = vmul.f32 %v806_v61, %v717_v37 }
 0xc7d   :  { %v844_v14 = vmul.f32 %v842_v12, %v840_v3 }
 0xce9   :  { %v810_v62 = vpop.permute.xlu0 %809 }
 0xcea   :  { %v812_v2 = vmul.f32 %v810_v62, %v806_v61 }
 0xceb   :  { %v847_v5 = vpop.permute.xlu1 %846 }
 0xcec   :  { %v849_v6 = vmul.f32 %v847_v5, %v840_v3  ;;  %814 = vrot.lane.b32.xlu2 %v812_v2, %s1467_s2 }
 0xcee   :  { %851 = vrot.lane.b32.xlu0 %v849_v6, %s1467_s2 }
 0xd46   :  { %v815_v8 = vpop.permute.xlu2 %814 }
 0xd47   :  { %v817_v10 = vadd.f32 %v815_v8, %v807_v7 }
 0xd49   :  { %1333 = vtanh.f32 %v817_v10 }
 0xd4f   :  { %v1334_v11 = vpop.eup %1333 }
 0xd50   :  { %820 = vrot.lane.b32.xlu1 %v1334_v11, %s1460_s23 }
 0xd60   :  { %v852_v15 = vpop.permute.xlu0 %851 }
 0xd61   :  { %v854_v16 = vadd.f32 %v852_v15, %v844_v14 }
 0xd63   :  { %1335 = vtanh.f32 %v854_v16  ;;  %v944_v42 = vrot.slane %v854_v16, 7 }
 0xd69   :  { %v1336_v17 = vpop.eup %1335 }
 0xd6a   :  { %857 = vrot.lane.b32.xlu2 %v1336_v17, %s1460_s23 }
 0xdc2   :  { %v821_v18 = vpop.permute.xlu1 %820 }
 0xdc3   :  { %v1676_v19 = vmul.f32 %v821_v18, %v806_v61 }
 0xdc4   :  { %v858_v20 = vpop.permute.xlu2 %857 }
 0xdc5   :  { %v860_v21 = vmul.f32 %v858_v20, %v840_v3  ;;  %v866_v51 = vrot.slane %v1676_v19, 3 }
 0xdc7   :  { %867 = vrot.lane.b32.xlu1 %v866_v51, %s1460_s23  ;;  %862 = vrot.lane.b32.xlu0 %v860_v21, %s1467_s2 }
 0xe39   :  { %v868_v58 = vpop.permute.xlu1 %867  ;;  %v863_v0 = vpop.permute.xlu0 %862 }
 0xe3a   :  { %v870_v4 = vsel %vm316_vm2, %v863_v0, %v868_v58 }
 0xe3b   :  { %v871_v22 = vpack.c.bf16 %v870_v4, %v870_v4 }
 0xe3d   :  { %v873_v23 = vshrl.u32 %v871_v22, 16 }
 0xe3f   :  { %v875_v25 = vrot.slane %v873_v23, 2 }
 0xe41   :  { %1251 = vmatmul.msk.bf16.vlgmr.msrb.gmra.mxu3 %vm359_vm3, %v875_v25  ;;  %1252 = vmatmul.msk.bf16.vlgmr.msra.gmra.mxu2 %vm359_vm3, %v875_v25 }
 0xec4   :  { %v888_v26 = vpop.f32.mrf.mxu3  ;;  %v901_v27 = vpop.f32.mrf.mxu2 }
 0xec5   :  { %v937_v28 = vrot.slane %v888_v26, 2  ;;  %v905_v30 = vadd.f32 %v901_v27, %v1581_v13 }
 0xec7   :  { %v939_v31 = vadd.f32 %v937_v28, %v1511_v36  ;;  %1337 = vtanh.f32 %v905_v30 }
 0xec9   :  { %1339 = vtanh.f32 %v939_v31 }
 0xecc   :  { %v890_v32 = vpop.f32.mrf.mxu3  ;;  %v903_v33 = vpop.f32.mrf.mxu2 }
 0xecd   :  { %v1338_v34 = vpop.eup %1337 }
 0xece   :  { %911 = vrot.lane.b32.xlu2 %v1338_v34, %s1460_s23  ;;  %v907_v37 = vadd.f32 1.0, %v1338_v34 }
 0xecf   :  { %v1340_v35 = vpop.eup %1339 }
 0xed0   :  { %948 = vrot.lane.b32.xlu0 %v1340_v35, %s1460_s23  ;;  %v908_v38 = vmul.f32 0.5, %v907_v37  ;;  %v941_v40 = vadd.f32 1.0, %v1340_v35 }
 0xed2   :  { %v942_v1 = vmul.f32 0.5, %v941_v40  ;;  %v909_v44 = vmul.f32 %v908_v38, %v817_v10 }
 0xed4   :  { %v946_v46 = vmul.f32 %v944_v42, %v942_v1 }
 0xf28   :  { %v912_v55 = vpop.permute.xlu2 %911 }
 0xf29   :  { %v914_v39 = vmul.f32 %v912_v55, %v908_v38 }
 0xf2b   :  { %916 = vrot.lane.b32.xlu1 %v914_v39, %s1467_s2 }
 0xf42   :  { %v949_v9 = vpop.permute.xlu0 %948 }
 0xf43   :  { %v951_v41 = vmul.f32 %v949_v9, %v942_v1 }
 0xf45   :  { %953 = vrot.lane.b32.xlu2 %v951_v41, %s1467_s2 }
 0xf9d   :  { %v917_v45 = vpop.permute.xlu1 %916 }
 0xf9e   :  { %v919_v47 = vadd.f32 %v917_v45, %v909_v44 }
 0xf9f   :  { %v954_v48 = vpop.permute.xlu2 %953 }
 0xfa0   :  { %1341 = vtanh.f32 %v919_v47  ;;  %v956_v49 = vadd.f32 %v954_v48, %v946_v46 }
 0xfa2   :  { %1343 = vtanh.f32 %v956_v49  ;;  %v1044_v4 = vrot.slane %v956_v49, 7 }
 0xfa6   :  { %v1342_v50 = vpop.eup %1341 }
 0xfa7   :  { %922 = vrot.lane.b32.xlu0 %v1342_v50, %s1460_s23 }
 0xfa8   :  { %v1344_v52 = vpop.eup %1343 }
 0xfa9   :  { %959 = vrot.lane.b32.xlu1 %v1344_v52, %s1460_s23 }
0x1019   :  { %v923_v53 = vpop.permute.xlu0 %922 }
0x101a   :  { %v1692_v54 = vmul.f32 %v923_v53, %v908_v38  ;;  %v413_v38 = vrot.slane %v1508_v29, 2 }
0x101b   :  { %v960_v56 = vpop.permute.xlu1 %959 }
0x101c   :  { %v962_v57 = vmul.f32 %v960_v56, %v942_v1  ;;  %v968_v60 = vrot.slane %v1692_v54, 2 }
0x101e   :  { %969 = vrot.lane.b32.xlu0 %v968_v60, %s1460_s23  ;;  %964 = vrot.lane.b32.xlu2 %v962_v57, %s1467_s2 }
0x1078   :  { %v965_v61 = vpop.permute.xlu2 %964 }
0x1090   :  { %v970_v62 = vpop.permute.xlu0 %969 }
0x1091   :  { %v972_v2 = vsel %vm316_vm2, %v965_v61, %v970_v62  ;;  %v426_v61 = vrot.slane %v1508_v29, 3 }
0x1092   :  { %v973_v3 = vpack.c.bf16 %v972_v2, %v972_v2 }
0x1094   :  { %v975_v5 = vrot.slane %v973_v3, 3 }
0x1096   :  { %1253 = vmatmul.msk.bf16.vlgmr.msrb.gmra.mxu0 %vm359_vm3, %v975_v5  ;;  %1254 = vmatmul.msk.bf16.vlgmr.msrb.gmra.mxu1 %vm359_vm3, %v975_v5 }
0x1113   :  { %v988_v6 = vpop.f32.mrf.mxu0  ;;  %v1001_v7 = vpop.f32.mrf.mxu1 }
0x1114   :  { %v1037_v8 = vrot.slane %v988_v6, 1  ;;  %v1005_v10 = vadd.f32 %v1001_v7, %v1581_v13 }
0x1116   :  { %v1039_v11 = vadd.f32 %v1037_v8, %v1511_v36  ;;  %1345 = vtanh.f32 %v1005_v10 }
0x1118   :  { %1347 = vtanh.f32 %v1039_v11 }
0x111b   :  { %v990_v12 = vpop.f32.mrf.mxu0  ;;  %v1003_v14 = vpop.f32.mrf.mxu1 }
0x111c   :  { %v1346_v15 = vpop.eup %1345 }
0x111d   :  { %1011 = vrot.lane.b32.xlu1 %v1346_v15, %s1460_s23  ;;  %v1007_v51 = vadd.f32 1.0, %v1346_v15 }
0x111e   :  { %v1348_v16 = vpop.eup %1347 }
0x111f   :  { %1048 = vrot.lane.b32.xlu2 %v1348_v16, %s1460_s23  ;;  %v1041_v17 = vadd.f32 1.0, %v1348_v16  ;;  %v1008_v58 = vmul.f32 0.5, %v1007_v51 }
0x1121   :  { %v1042_v18 = vmul.f32 0.5, %v1041_v17  ;;  %v1009_v27 = vmul.f32 %v1008_v58, %v919_v47 }
0x1123   :  { %v1046_v22 = vmul.f32 %v1044_v4, %v1042_v18 }
0x1179   :  { %v1049_v20 = vpop.permute.xlu2 %1048 }
0x117a   :  { %v1051_v21 = vmul.f32 %v1049_v20, %v1042_v18 }
0x117c   :  { %1053 = vrot.lane.b32.xlu1 %v1051_v21, %s1467_s2 }
0x118f   :  { %v1012_v0 = vpop.permute.xlu1 %1011 }
0x1190   :  { %v1014_v36 = vmul.f32 %v1012_v0, %v1008_v58 }
0x1192   :  { %1016 = vrot.lane.b32.xlu0 %v1014_v36, %s1467_s2 }
0x11ee   :  { %v1054_v23 = vpop.permute.xlu1 %1053 }
0x11ef   :  { %v1056_v25 = vadd.f32 %v1054_v23, %v1046_v22 }
0x11f1   :  { %1349 = vtanh.f32 %v1056_v25 }
0x11f7   :  { %v1350_v26 = vpop.eup %1349 }
0x11f8   :  { %1059 = vrot.lane.b32.xlu0 %v1350_v26, %s1460_s23 }
0x1204   :  { %v1017_v28 = vpop.permute.xlu0 %1016 }
0x1205   :  { %v1019_v30 = vadd.f32 %v1017_v28, %v1009_v27 }
0x1207   :  { %1351 = vtanh.f32 %v1019_v30 }
0x120d   :  { %v1352_v31 = vpop.eup %1351 }
0x120e   :  { %1022 = vrot.lane.b32.xlu2 %v1352_v31, %s1460_s23 }
0x1268   :  { %v1023_v32 = vpop.permute.xlu2 %1022 }
0x1269   :  { %v1025_v33 = vmul.f32 %v1023_v32, %v1008_v58 }
0x126a   :  { %v1060_v34 = vpop.permute.xlu0 %1059 }
0x126b   :  { %v1062_v35 = vmul.f32 %v1060_v34, %v1042_v18  ;;  %v1068_v37 = vrot.slane %v1025_v33, 1 }
0x126d   :  { %1069 = vrot.lane.b32.xlu2 %v1068_v37, %s1460_s23  ;;  %1064 = vrot.lane.b32.xlu1 %v1062_v35, %s1467_s2 }
0x1275   :  { %414 = vrot.lane.b32.xlu2 %v413_v38, %s1468_s3 }
0x12c7   :  { %v1070_v55 = vpop.permute.xlu2 %1069 }
0x12cf   :  { %v415_v39 = vpop.permute.xlu2 %414 }
0x12d0   :  { %v522_v40 = vmul.f32 %v1616_v24, %v415_v39  ;;  %v622_v1 = vmul.f32 %v1640_v63, %v415_v39  ;;  %v417_v63 = vmul.f32 %v415_v39, %v1592_v43  ;;  %v724_v2 = vmul.f32 %v1660_v59, %v415_v39 }
0x12d1   :  { %v1026_v3 = vmul.f32 %v1025_v33, %v415_v39  ;;  %v926_v15 = vmul.f32 %v1692_v54, %v415_v39  ;;  %v824_v16 = vmul.f32 %v1676_v19, %v415_v39 }
0x12d2   :  { %524 = vrot.lane.b32.xlu2 %v522_v40, %s1467_s2 }
0x12da   :  { %624 = vrot.lane.b32.xlu2 %v622_v1, %s1467_s2 }
0x12df   :  { %v1065_v9 = vpop.permute.xlu1 %1064 }
0x12e0   :  { %v1072_v41 = vsel %vm316_vm2, %v1065_v9, %v1070_v55 }
0x12e1   :  { %v1073_v42 = vpack.c.bf16 %v1072_v41, %v1072_v41 }
0x12e3   :  { %v1075_v44 = vshrl.u32 %v1073_v42, 16 }
0x12e5   :  { %v1077_v45 = vrot.slane %v1075_v44, 3 }
0x12e7   :  { %1255 = vmatmul.msk.bf16.vlgmr.msra.gmra.mxu3 %vm359_vm3, %v1077_v45 }
0x132c   :  { %v525_v49 = vpop.permute.xlu2 %524 }
0x132d   :  { %v527_v50 = vsel %vm422_vm4, %v525_v49, 0.0 }
0x1334   :  { %v625_v59 = vpop.permute.xlu2 %624 }
0x1335   :  { %v627_v11 = vsel %vm422_vm4, %v625_v59, 0.0 }
0x136a   :  { %v1090_v47 = vpop.f32.mrf.mxu3 }
0x136b   :  { %v1094_v46 = vadd.f32 %v1090_v47, %v1581_v13 }
0x136d   :  { %1353 = vtanh.f32 %v1094_v46 }
0x1372   :  { %v1092_v48 = vpop.f32.mrf.mxu3 }
0x1373   :  { %v1354_v24 = vpop.eup %1353 }
0x1374   :  { %1100 = vrot.lane.b32.xlu0 %v1354_v24, %s1460_s23  ;;  %v1096_v52 = vadd.f32 1.0, %v1354_v24 }
0x1376   :  { %v1097_v53 = vmul.f32 0.5, %v1096_v52 }
0x1378   :  { %v1098_v5 = vmul.f32 %v1097_v53, %v1019_v30 }
0x137c   :  { %419 = vrot.lane.b32.xlu0 %v417_v63, %s1467_s2 }
0x13a6   :  { %528 = vadd.xlane.f32.xlu0 %v527_v50 }
0x13e6   :  { %v1101_v56 = vpop.permute.xlu0 %1100 }
0x13e7   :  { %v1103_v57 = vmul.f32 %v1101_v56, %v1097_v53 }
0x13e9   :  { %1105 = vrot.lane.b32.xlu1 %v1103_v57, %s1467_s2 }
0x13ee   :  { %v420_v13 = vpop.permute.xlu0 %419 }
0x13ef   :  { %v423_v60 = vsel %vm422_vm4, %v420_v13, 0.0 }
0x1413   :  { %424 = vadd.xlane.f32.xlu1 %v423_v60 }
0x1419   :  { %v529_v43 = vpop.xlane.xlu0 %528 }
0x141a   :  { %v530_v62 = vadd.f32 %v529_v43, %v426_v61 }
0x141c   :  { %531 = vst.msk [vmem:[%s1776_s4 + $0x1] sm:$0x1] %vm429_vm5, %v530_v62 }
0x142c   :  { %726 = vrot.lane.b32.xlu1 %v724_v2, %s1467_s2 }
0x1434   :  { %1028 = vrot.lane.b32.xlu1 %v1026_v3, %s1467_s2 }
0x145b   :  { %v1106_v6 = vpop.permute.xlu1 %1105 }
0x145c   :  { %v1108_v7 = vadd.f32 %v1106_v6, %v1098_v5 }
0x145e   :  { %1355 = vtanh.f32 %v1108_v7 }
0x1464   :  { %v1356_v29 = vpop.eup %1355 }
0x1465   :  { %1111 = vrot.lane.b32.xlu2 %v1356_v29, %s1460_s23 }
0x1486   :  { %v425_v8 = vpop.xlane.xlu1 %424 }
0x1487   :  { %v428_v10 = vadd.f32 %v426_v61, %v425_v8 }
0x1489   :  { %430 = vst.msk [vmem:[%s1776_s4] sm:$0x1] %vm429_vm5, %v428_v10 }
0x148e   :  { %628 = vadd.xlane.f32.xlu2 %v627_v11 }
0x149e   :  { %v727_v12 = vpop.permute.xlu1 %726 }
0x149f   :  { %v729_v14 = vsel %vm422_vm4, %v727_v12, 0.0 }
0x14a0   :  { %730 = vadd.xlane.f32.xlu0 %v729_v14 }
0x14a6   :  { %928 = vrot.lane.b32.xlu2 %v926_v15, %s1467_s2  ;;  %v1029_v21 = vpop.permute.xlu1 %1028 }
0x14a7   :  { %v1031_v51 = vsel %vm422_vm4, %v1029_v21, 0.0 }
0x14b4   :  { %826 = vrot.lane.b32.xlu0 %v824_v16, %s1467_s2 }
0x14bf   :  { %v1112_v17 = vpop.permute.xlu2 %1111 }
0x14c0   :  { %v1114_v18 = vmul.f32 %v1112_v17, %v1097_v53 }
0x14c2   :  { %v1115_v20 = vmul.f32 %v1114_v18, %v415_v39 }
0x14c4   :  { %1117 = vrot.lane.b32.xlu1 %v1115_v20, %s1467_s2 }
0x14cf   :  { %1032 = vadd.xlane.f32.xlu2 %v1031_v51 }
0x1501   :  { %v629_v58 = vpop.xlane.xlu2 %628 }
0x1502   :  { %v630_v0 = vadd.f32 %v629_v58, %v426_v61 }
0x1504   :  { %631 = vst.msk [vmem:[%s1776_s4 + $0x2] sm:$0x1] %vm429_vm5, %v630_v0 }
0x1509   :  { %v929_v54 = vpop.permute.xlu2 %928 }
0x150a   :  { %v931_v19 = vsel %vm422_vm4, %v929_v54, 0.0 }
0x150b   :  { %932 = vadd.xlane.f32.xlu1 %v931_v19 }
0x1513   :  { %v731_v36 = vpop.xlane.xlu0 %730 }
0x1514   :  { %v732_v4 = vadd.f32 %v731_v36, %v426_v61 }
0x1516   :  { %733 = vst.msk [vmem:[%s1776_s4 + $0x3] sm:$0x1] %vm429_vm5, %v732_v4 }
0x1526   :  { %v827_v22 = vpop.permute.xlu0 %826 }
0x1527   :  { %v829_v23 = vsel %vm422_vm4, %v827_v22, 0.0 }
0x1528   :  { %830 = vadd.xlane.f32.xlu0 %v829_v23 }
0x1536   :  { %v1118_v25 = vpop.permute.xlu1 %1117 }
0x1537   :  { %v1120_v26 = vsel %vm422_vm4, %v1118_v25, 0.0 }
0x1538   :  { %1121 = vadd.xlane.f32.xlu0 %v1120_v26 }
0x1542   :  { %v1033_v27 = vpop.xlane.xlu2 %1032 }
0x1543   :  { %v1034_v28 = vadd.f32 %v1033_v27, %v426_v61 }
0x1545   :  { %1035 = vst.msk [vmem:[%s1776_s4 + $0x6] sm:$0x1] %vm429_vm5, %v1034_v28 }
0x157e   :  { %v933_v30 = vpop.xlane.xlu1 %932 }
0x157f   :  { %v934_v31 = vadd.f32 %v933_v30, %v426_v61 }
0x1581   :  { %935 = vst.msk [vmem:[%s1776_s4 + $0x5] sm:$0x1] %vm429_vm5, %v934_v31 }
0x159b   :  { %v831_v32 = vpop.xlane.xlu0 %830 }
0x159c   :  { %v832_v33 = vadd.f32 %v831_v32, %v426_v61 }
0x159e   :  { %833 = vst.msk [vmem:[%s1776_s4 + $0x4] sm:$0x1] %vm429_vm5, %v832_v33 }
0x15ab   :  { %v1122_v34 = vpop.xlane.xlu0 %1121 }
0x15ac   :  { %v1123_v35 = vadd.f32 %v1122_v34, %v426_v61 }
0x15ae   :  { %1124 = vst.msk [vmem:[%s1776_s4 + $0x7] sm:$0x1] %vm429_vm5, %v1123_v35 }
0x15af   :  { %1129 = vsyncpa [#allocation3], 1 }
0x15b0   :  { %1130 = vsyncpa [#allocation5], 1 }
0x15b1   :  { %1131 = vsyncpa [#allocation8], 1 }

</bundles_post_ra>
